<compile_context>
chip_gen: v7x
topology: tpu7x:2x2x1
jax: 0.10.0
libtpu: 0.0.40
codegen_flags: <defaults>
</compile_context>

<pallas_src>
import jax
import jax.numpy as jnp
from jax.experimental import pallas as pl
from jax.experimental.pallas import tpu as pltpu


def cbow_kernel(idx_ref, emb_hbm, w_ref, out_ref,
                emb_vmem, means_ref, m_ref, l_ref, logits_ref, sem):
    p = pl.program_id(0)      # 0: stream W, compute logits + online logsumexp; 1: normalized writeback
    j = pl.program_id(1)      # vocab-tile index
    B, C = idx_ref.shape

    # ---- prologue (runs once): bulk emb DMA, in-VMEM row gather, mean over C ----
    @pl.when(jnp.logical_and(p == 0, j == 0))
    def _prologue():
        cp = pltpu.make_async_copy(emb_hbm, emb_vmem, sem)   # one bulk table DMA (no 64x row DMAs)
        cp.start()
        cp.wait()
        rows = []
        for b in range(B):                                   # B, C small & static -> fully unrolled
            acc = emb_vmem[pl.ds(idx_ref[b, 0], 1), :]       # (1, D) dynamic row read from VMEM
            for c in range(1, C):
                acc = acc + emb_vmem[pl.ds(idx_ref[b, c], 1), :]
            rows.append(acc)
        means = jnp.concatenate(rows, axis=0) * (1.0 / C)    # (B, D), f32 on the VPU
        means_ref[...] = means.astype(means_ref.dtype)       # cast ONCE to the W-stream dtype
        m_ref[...] = jnp.full_like(m_ref, -jnp.inf)
        l_ref[...] = jnp.zeros_like(l_ref)

    # ---- pass 0: one logits tile + online max / sum(exp) ----
    @pl.when(p == 0)
    def _stats():
        # logits_tile = means @ w_tile.T  (contract on D; w kept in PyTorch (V, D) layout)
        s = jax.lax.dot_general(
            means_ref[...], w_ref[...],
            dimension_numbers=(((1,), (1,)), ((), ())),
            preferred_element_type=jnp.float32)              # (B, TV), f32 accumulation
        logits_ref[j] = s                                    # cache tile (dynamic first axis)
        m_prev = m_ref[...]
        m_new = jnp.maximum(m_prev, jnp.max(s, axis=1, keepdims=True))
        l_ref[...] = (l_ref[...] * jnp.exp(m_prev - m_new)
                      + jnp.sum(jnp.exp(s - m_new), axis=1, keepdims=True))
        m_ref[...] = m_new

    # ---- pass 1: stream out normalized log-probs, one lane-dense (B, TV) tile per step ----
    @pl.when(p == 1)
    def _write():
        norm = m_ref[...] + jnp.log(l_ref[...])              # (B, 1)
        out_ref[...] = (logits_ref[j] - norm).astype(out_ref.dtype)


def _pad(x, m):
    return -(-x // m) * m


def _estimate_vmem_bytes(B, V, D, tile_v, n_vt, w_itemsize, out_itemsize):
    lane, sub = 128, 8
    Bp, Dp, TVp = _pad(B, sub), _pad(D, lane), _pad(tile_v, lane)
    emb_tbl = _pad(V, sub) * Dp * 4                 # VMEM-resident embedding table (f32)
    w_tiles = 2 * _pad(tile_v, sub) * Dp * w_itemsize   # double-buffered W tiles
    out_tiles = 2 * Bp * TVp * out_itemsize             # double-buffered output tiles
    logits = n_vt * Bp * TVp * 4                          # cached logits (B*V*4 total)
    small = Bp * Dp * max(w_itemsize, 4) + 2 * Bp * lane * 4
    return emb_tbl + w_tiles + out_tiles + logits + small


def cbow_forward(idx, emb, w, *, tile_v=None, out_dtype=jnp.float32):
    """idx: (B, C) int; emb: (V, D) f32; w: (V, D) f32/bf16 (PyTorch nn.Linear layout, used as-is).

    Pass w (and optionally a bf16 persistent copy of it) directly: the kernel streams it in its
    stored dtype, so storing W as bf16 in HBM halves the dominant memory traffic.
    """
    B, C = idx.shape
    V, D = emb.shape
    assert w.shape == (V, D)
    assert V % 128 == 0, "V must be a multiple of 128"
    # TODO(synk): pad + mask the last vocab tile (and the max/sum-exp) for arbitrary V.
    idx = idx.astype(jnp.int32)

    w_itemsize = jnp.dtype(w.dtype).itemsize
    out_itemsize = jnp.dtype(out_dtype).itemsize

    if tile_v is None:
        # Size each W tile to ~2 MiB so per-grid-step overhead (~0.35 us) is amortized.
        budget = 2 << 20
        tile_v = max(128, (budget // (D * w_itemsize)) // 128 * 128)
    tile_v = max(128, (min(tile_v, V) // 128) * 128)
    while V % tile_v != 0 or tile_v % 128 != 0:     # largest 128-multiple that divides V
        tile_v -= 128
    n_vt = V // tile_v

    est = _estimate_vmem_bytes(B, V, D, tile_v, n_vt, w_itemsize, out_itemsize)
    # The logits cache scales as B*V*4 and the emb table is held resident: guard v7x (64 MiB phys).
    assert est <= (48 << 20), (
        f"estimated VMEM {est/2**20:.1f} MiB too large; shrink B/V or spill the logits cache")
    # TODO(synk): re-stream W in pass 1 / spill the logits cache to HBM when B*V grows too large.
    vmem_limit = int(min(max(2 * est + (8 << 20), 32 << 20), 100 << 20))

    grid_spec = pltpu.PrefetchScalarGridSpec(
        num_scalar_prefetch=1,                       # idx lives in SMEM
        grid=(2, n_vt),                              # (pass, vocab tile)
        in_specs=[
            pl.BlockSpec(memory_space=pl.ANY),       # emb stays in HBM; bulk-DMA'd once in prologue
            # W streamed tile-by-tile in pass 0; pass 1 pins the already-resident LAST block.
            pl.BlockSpec((tile_v, D),
                         lambda p, j, idx_sm: ((1 - p) * j + p * (n_vt - 1), 0)),
        ],
        # Output block held at (0,0) through pass 0, then written once per tile during pass 1
        # (lane-dense tile_v-wide stores).
        out_specs=pl.BlockSpec((B, tile_v), lambda p, j, idx_sm: (0, p * j)),
        scratch_shapes=[
            pltpu.VMEM((V, D), emb.dtype),           # resident embedding table
            pltpu.VMEM((B, D), w.dtype),             # context means, pre-cast to W-stream dtype
            pltpu.VMEM((B, 1), jnp.float32),         # running max
            pltpu.VMEM((B, 1), jnp.float32),         # running sum(exp)
            pltpu.VMEM((n_vt, B, tile_v), jnp.float32),  # cached logits (B*V f32)
            pltpu.SemaphoreType.DMA,                 # bulk emb copy
        ],
    )

    return pl.pallas_call(
        cbow_kernel,
        out_shape=jax.ShapeDtypeStruct((B, V), out_dtype),
        grid_spec=grid_spec,
        compiler_params=pltpu.CompilerParams(
            # Both axes carry state (means / online logsumexp / cached logits) -> arbitrary.
            # TODO(synk): for v7x megacore, split the vocab axis across the 2 TensorCores with a
            # per-half logsumexp merge (or a leading "parallel" batch axis once B >= 16).
            dimension_semantics=("arbitrary", "arbitrary"),
            vmem_limit_bytes=vmem_limit),
    )(idx, emb, w)


def cbow_reference(idx, emb, w):
    embeds = emb[idx]                      # (B, C, D)
    means = jnp.mean(embeds, axis=1)       # (B, D)
    logits = means @ w.T                   # (B, V)
    return jax.nn.log_softmax(logits, axis=1)


if __name__ == "__main__":
    vocab_size = 256      # V (multiple of 128 so vocab tiles stay lane-aligned)
    embedding_dim = 32    # D (module default is 20; 32 keeps the lane layout clean)
    batch = 8             # B
    context = 8           # C

    key = jax.random.PRNGKey(0)
    k_emb, k_w, k_idx = jax.random.split(key, 3)

    # nn.Embedding default init ~ N(0,1); padding_idx=0 -> row 0 zeroed.
    emb = jax.random.normal(k_emb, (vocab_size, embedding_dim), dtype=jnp.float32)
    emb = emb.at[0].set(0.0)
    # nn.Linear(bias=False) weight, shape (vocab_size, embedding_dim).
    w = 0.1 * jax.random.normal(k_w, (vocab_size, embedding_dim), dtype=jnp.float32)
    idx = jax.random.randint(k_idx, (batch, context), 0, vocab_size, dtype=jnp.int32)

    ref = cbow_reference(idx, emb, w)

    # 1) default (budget-sized) vocab tile, f32 W stream / f32 out -> tight parity with PyTorch f32.
    out = jax.block_until_ready(cbow_forward(idx, emb, w))
    assert out.shape == (batch, vocab_size)
    assert jnp.allclose(out, ref, atol=1e-5, rtol=1e-5)

    # 2) tile_v=128 (2 vocab tiles) -> exercises the online logsumexp across tiles.
    out_t = jax.block_until_ready(cbow_forward(idx, emb, w, tile_v=128))
    assert jnp.allclose(out_t, ref, atol=1e-5, rtol=1e-5)

    # 3) bf16 W stream (halves the dominant HBM traffic); the means are cast to bf16 too, so
    #    parity vs the f32 reference is intentionally looser.
    w_bf16 = w.astype(jnp.bfloat16)   # in real use: a persistent bf16 copy reused across calls
    out_bf = jax.block_until_ready(cbow_forward(idx, emb, w_bf16, tile_v=128))
    assert jnp.allclose(out_bf, ref, atol=3e-2, rtol=0)

    # 4) bf16 W stream + bf16 output (trims residual output write traffic).
    out_bf_o = jax.block_until_ready(
        cbow_forward(idx, emb, w_bf16, tile_v=128, out_dtype=jnp.bfloat16))
    assert jnp.allclose(out_bf_o.astype(jnp.float32), ref, atol=1e-1, rtol=0)

    print("KERNEL_OK")
</pallas_src>

<mosaic_0001>
module attributes {stable_mosaic.version = 11 : i64} {
  func.func @cbow_kernel(%arg0: i32, %arg1: i32, %arg2: memref<8x8xi32, #tpu.memory_space<smem>>, %arg3: memref<256x32xf32, #tpu.memory_space<any>>, %arg4: memref<256x32xf32, #tpu.memory_space<vmem>>, %arg5: memref<8x256xf32, #tpu.memory_space<vmem>>, %arg6: memref<256x32xf32, #tpu.memory_space<vmem>>, %arg7: memref<8x32xf32, #tpu.memory_space<vmem>>, %arg8: memref<8x1xf32, #tpu.memory_space<vmem>>, %arg9: memref<8x1xf32, #tpu.memory_space<vmem>>, %arg10: memref<1x8x256xf32, #tpu.memory_space<vmem>>, %arg11: memref<!tpu.dma_semaphore, #tpu.memory_space<semaphore_mem>>) attributes {dimension_semantics = [#tpu.dimension_semantics<arbitrary>, #tpu.dimension_semantics<arbitrary>], iteration_bounds = array<i64: 2, 1>, scalar_prefetch = 1 : i64, scratch_operands = 6 : i64, tpu.core_type = #tpu.core_type<tc>, window_params = [{}, {transform_indices = @transform_1, window_bounds = array<i64: 256, 32>}, {transform_indices = @transform_2, window_bounds = array<i64: 8, 256>}]} {
    %c0_i32 = arith.constant 0 : i32
    %0 = arith.cmpi eq, %arg0, %c0_i32 : i32
    %c0_i32_0 = arith.constant 0 : i32
    %1 = arith.cmpi eq, %arg1, %c0_i32_0 : i32
    %2 = arith.andi %0, %1 : i1
    %3 = arith.extui %2 : i1 to i32
    %c0_i32_1 = arith.constant 0 : i32
    %4 = arith.cmpi ne, %3, %c0_i32_1 : i32
    scf.if %4 {
      tpu.enqueue_dma source(%arg3 : memref<256x32xf32, #tpu.memory_space<any>>) target(%arg6 : memref<256x32xf32, #tpu.memory_space<vmem>>) target_semaphore(%arg11 : memref<!tpu.dma_semaphore, #tpu.memory_space<semaphore_mem>>)
      tpu.wait_dma2 semaphore(%arg11 : memref<!tpu.dma_semaphore, #tpu.memory_space<semaphore_mem>>) src(%arg3 : memref<256x32xf32, #tpu.memory_space<any>>) dst(%arg6 : memref<256x32xf32, #tpu.memory_space<vmem>>)
      %c0 = arith.constant 0 : index
      %c0_5 = arith.constant 0 : index
      %11 = memref.load %arg2[%c0, %c0_5] : memref<8x8xi32, #tpu.memory_space<smem>>
      %12 = arith.index_cast %11 : i32 to index
      %c0_6 = arith.constant 0 : index
      %13 = vector.load %arg6[%12, %c0_6] : memref<256x32xf32, #tpu.memory_space<vmem>>, vector<1x32xf32>
      %c0_7 = arith.constant 0 : index
      %c1 = arith.constant 1 : index
      %14 = memref.load %arg2[%c0_7, %c1] : memref<8x8xi32, #tpu.memory_space<smem>>
      %15 = arith.index_cast %14 : i32 to index
      %c0_8 = arith.constant 0 : index
      %16 = vector.load %arg6[%15, %c0_8] : memref<256x32xf32, #tpu.memory_space<vmem>>, vector<1x32xf32>
      %17 = arith.addf %13, %16 : vector<1x32xf32>
      %c0_9 = arith.constant 0 : index
      %c2 = arith.constant 2 : index
      %18 = memref.load %arg2[%c0_9, %c2] : memref<8x8xi32, #tpu.memory_space<smem>>
      %19 = arith.index_cast %18 : i32 to index
      %c0_10 = arith.constant 0 : index
      %20 = vector.load %arg6[%19, %c0_10] : memref<256x32xf32, #tpu.memory_space<vmem>>, vector<1x32xf32>
      %21 = arith.addf %17, %20 : vector<1x32xf32>
      %c0_11 = arith.constant 0 : index
      %c3 = arith.constant 3 : index
      %22 = memref.load %arg2[%c0_11, %c3] : memref<8x8xi32, #tpu.memory_space<smem>>
      %23 = arith.index_cast %22 : i32 to index
      %c0_12 = arith.constant 0 : index
      %24 = vector.load %arg6[%23, %c0_12] : memref<256x32xf32, #tpu.memory_space<vmem>>, vector<1x32xf32>
      %25 = arith.addf %21, %24 : vector<1x32xf32>
      %c0_13 = arith.constant 0 : index
      %c4 = arith.constant 4 : index
      %26 = memref.load %arg2[%c0_13, %c4] : memref<8x8xi32, #tpu.memory_space<smem>>
      %27 = arith.index_cast %26 : i32 to index
      %c0_14 = arith.constant 0 : index
      %28 = vector.load %arg6[%27, %c0_14] : memref<256x32xf32, #tpu.memory_space<vmem>>, vector<1x32xf32>
      %29 = arith.addf %25, %28 : vector<1x32xf32>
      %c0_15 = arith.constant 0 : index
      %c5 = arith.constant 5 : index
      %30 = memref.load %arg2[%c0_15, %c5] : memref<8x8xi32, #tpu.memory_space<smem>>
      %31 = arith.index_cast %30 : i32 to index
      %c0_16 = arith.constant 0 : index
      %32 = vector.load %arg6[%31, %c0_16] : memref<256x32xf32, #tpu.memory_space<vmem>>, vector<1x32xf32>
      %33 = arith.addf %29, %32 : vector<1x32xf32>
      %c0_17 = arith.constant 0 : index
      %c6 = arith.constant 6 : index
      %34 = memref.load %arg2[%c0_17, %c6] : memref<8x8xi32, #tpu.memory_space<smem>>
      %35 = arith.index_cast %34 : i32 to index
      %c0_18 = arith.constant 0 : index
      %36 = vector.load %arg6[%35, %c0_18] : memref<256x32xf32, #tpu.memory_space<vmem>>, vector<1x32xf32>
      %37 = arith.addf %33, %36 : vector<1x32xf32>
      %c0_19 = arith.constant 0 : index
      %c7 = arith.constant 7 : index
      %38 = memref.load %arg2[%c0_19, %c7] : memref<8x8xi32, #tpu.memory_space<smem>>
      %39 = arith.index_cast %38 : i32 to index
      %c0_20 = arith.constant 0 : index
      %40 = vector.load %arg6[%39, %c0_20] : memref<256x32xf32, #tpu.memory_space<vmem>>, vector<1x32xf32>
      %41 = arith.addf %37, %40 : vector<1x32xf32>
      %c1_21 = arith.constant 1 : index
      %c0_22 = arith.constant 0 : index
      %42 = memref.load %arg2[%c1_21, %c0_22] : memref<8x8xi32, #tpu.memory_space<smem>>
      %43 = arith.index_cast %42 : i32 to index
      %c0_23 = arith.constant 0 : index
      %44 = vector.load %arg6[%43, %c0_23] : memref<256x32xf32, #tpu.memory_space<vmem>>, vector<1x32xf32>
      %c1_24 = arith.constant 1 : index
      %c1_25 = arith.constant 1 : index
      %45 = memref.load %arg2[%c1_24, %c1_25] : memref<8x8xi32, #tpu.memory_space<smem>>
      %46 = arith.index_cast %45 : i32 to index
      %c0_26 = arith.constant 0 : index
      %47 = vector.load %arg6[%46, %c0_26] : memref<256x32xf32, #tpu.memory_space<vmem>>, vector<1x32xf32>
      %48 = arith.addf %44, %47 : vector<1x32xf32>
      %c1_27 = arith.constant 1 : index
      %c2_28 = arith.constant 2 : index
      %49 = memref.load %arg2[%c1_27, %c2_28] : memref<8x8xi32, #tpu.memory_space<smem>>
      %50 = arith.index_cast %49 : i32 to index
      %c0_29 = arith.constant 0 : index
      %51 = vector.load %arg6[%50, %c0_29] : memref<256x32xf32, #tpu.memory_space<vmem>>, vector<1x32xf32>
      %52 = arith.addf %48, %51 : vector<1x32xf32>
      %c1_30 = arith.constant 1 : index
      %c3_31 = arith.constant 3 : index
      %53 = memref.load %arg2[%c1_30, %c3_31] : memref<8x8xi32, #tpu.memory_space<smem>>
      %54 = arith.index_cast %53 : i32 to index
      %c0_32 = arith.constant 0 : index
      %55 = vector.load %arg6[%54, %c0_32] : memref<256x32xf32, #tpu.memory_space<vmem>>, vector<1x32xf32>
      %56 = arith.addf %52, %55 : vector<1x32xf32>
      %c1_33 = arith.constant 1 : index
      %c4_34 = arith.constant 4 : index
      %57 = memref.load %arg2[%c1_33, %c4_34] : memref<8x8xi32, #tpu.memory_space<smem>>
      %58 = arith.index_cast %57 : i32 to index
      %c0_35 = arith.constant 0 : index
      %59 = vector.load %arg6[%58, %c0_35] : memref<256x32xf32, #tpu.memory_space<vmem>>, vector<1x32xf32>
      %60 = arith.addf %56, %59 : vector<1x32xf32>
      %c1_36 = arith.constant 1 : index
      %c5_37 = arith.constant 5 : index
      %61 = memref.load %arg2[%c1_36, %c5_37] : memref<8x8xi32, #tpu.memory_space<smem>>
      %62 = arith.index_cast %61 : i32 to index
      %c0_38 = arith.constant 0 : index
      %63 = vector.load %arg6[%62, %c0_38] : memref<256x32xf32, #tpu.memory_space<vmem>>, vector<1x32xf32>
      %64 = arith.addf %60, %63 : vector<1x32xf32>
      %c1_39 = arith.constant 1 : index
      %c6_40 = arith.constant 6 : index
      %65 = memref.load %arg2[%c1_39, %c6_40] : memref<8x8xi32, #tpu.memory_space<smem>>
      %66 = arith.index_cast %65 : i32 to index
      %c0_41 = arith.constant 0 : index
      %67 = vector.load %arg6[%66, %c0_41] : memref<256x32xf32, #tpu.memory_space<vmem>>, vector<1x32xf32>
      %68 = arith.addf %64, %67 : vector<1x32xf32>
      %c1_42 = arith.constant 1 : index
      %c7_43 = arith.constant 7 : index
      %69 = memref.load %arg2[%c1_42, %c7_43] : memref<8x8xi32, #tpu.memory_space<smem>>
      %70 = arith.index_cast %69 : i32 to index
      %c0_44 = arith.constant 0 : index
      %71 = vector.load %arg6[%70, %c0_44] : memref<256x32xf32, #tpu.memory_space<vmem>>, vector<1x32xf32>
      %72 = arith.addf %68, %71 : vector<1x32xf32>
      %c2_45 = arith.constant 2 : index
      %c0_46 = arith.constant 0 : index
      %73 = memref.load %arg2[%c2_45, %c0_46] : memref<8x8xi32, #tpu.memory_space<smem>>
      %74 = arith.index_cast %73 : i32 to index
      %c0_47 = arith.constant 0 : index
      %75 = vector.load %arg6[%74, %c0_47] : memref<256x32xf32, #tpu.memory_space<vmem>>, vector<1x32xf32>
      %c2_48 = arith.constant 2 : index
      %c1_49 = arith.constant 1 : index
      %76 = memref.load %arg2[%c2_48, %c1_49] : memref<8x8xi32, #tpu.memory_space<smem>>
      %77 = arith.index_cast %76 : i32 to index
      %c0_50 = arith.constant 0 : index
      %78 = vector.load %arg6[%77, %c0_50] : memref<256x32xf32, #tpu.memory_space<vmem>>, vector<1x32xf32>
      %79 = arith.addf %75, %78 : vector<1x32xf32>
      %c2_51 = arith.constant 2 : index
      %c2_52 = arith.constant 2 : index
      %80 = memref.load %arg2[%c2_51, %c2_52] : memref<8x8xi32, #tpu.memory_space<smem>>
      %81 = arith.index_cast %80 : i32 to index
      %c0_53 = arith.constant 0 : index
      %82 = vector.load %arg6[%81, %c0_53] : memref<256x32xf32, #tpu.memory_space<vmem>>, vector<1x32xf32>
      %83 = arith.addf %79, %82 : vector<1x32xf32>
      %c2_54 = arith.constant 2 : index
      %c3_55 = arith.constant 3 : index
      %84 = memref.load %arg2[%c2_54, %c3_55] : memref<8x8xi32, #tpu.memory_space<smem>>
      %85 = arith.index_cast %84 : i32 to index
      %c0_56 = arith.constant 0 : index
      %86 = vector.load %arg6[%85, %c0_56] : memref<256x32xf32, #tpu.memory_space<vmem>>, vector<1x32xf32>
      %87 = arith.addf %83, %86 : vector<1x32xf32>
      %c2_57 = arith.constant 2 : index
      %c4_58 = arith.constant 4 : index
      %88 = memref.load %arg2[%c2_57, %c4_58] : memref<8x8xi32, #tpu.memory_space<smem>>
      %89 = arith.index_cast %88 : i32 to index
      %c0_59 = arith.constant 0 : index
      %90 = vector.load %arg6[%89, %c0_59] : memref<256x32xf32, #tpu.memory_space<vmem>>, vector<1x32xf32>
      %91 = arith.addf %87, %90 : vector<1x32xf32>
      %c2_60 = arith.constant 2 : index
      %c5_61 = arith.constant 5 : index
      %92 = memref.load %arg2[%c2_60, %c5_61] : memref<8x8xi32, #tpu.memory_space<smem>>
      %93 = arith.index_cast %92 : i32 to index
      %c0_62 = arith.constant 0 : index
      %94 = vector.load %arg6[%93, %c0_62] : memref<256x32xf32, #tpu.memory_space<vmem>>, vector<1x32xf32>
      %95 = arith.addf %91, %94 : vector<1x32xf32>
      %c2_63 = arith.constant 2 : index
      %c6_64 = arith.constant 6 : index
      %96 = memref.load %arg2[%c2_63, %c6_64] : memref<8x8xi32, #tpu.memory_space<smem>>
      %97 = arith.index_cast %96 : i32 to index
      %c0_65 = arith.constant 0 : index
      %98 = vector.load %arg6[%97, %c0_65] : memref<256x32xf32, #tpu.memory_space<vmem>>, vector<1x32xf32>
      %99 = arith.addf %95, %98 : vector<1x32xf32>
      %c2_66 = arith.constant 2 : index
      %c7_67 = arith.constant 7 : index
      %100 = memref.load %arg2[%c2_66, %c7_67] : memref<8x8xi32, #tpu.memory_space<smem>>
      %101 = arith.index_cast %100 : i32 to index
      %c0_68 = arith.constant 0 : index
      %102 = vector.load %arg6[%101, %c0_68] : memref<256x32xf32, #tpu.memory_space<vmem>>, vector<1x32xf32>
      %103 = arith.addf %99, %102 : vector<1x32xf32>
      %c3_69 = arith.constant 3 : index
      %c0_70 = arith.constant 0 : index
      %104 = memref.load %arg2[%c3_69, %c0_70] : memref<8x8xi32, #tpu.memory_space<smem>>
      %105 = arith.index_cast %104 : i32 to index
      %c0_71 = arith.constant 0 : index
      %106 = vector.load %arg6[%105, %c0_71] : memref<256x32xf32, #tpu.memory_space<vmem>>, vector<1x32xf32>
      %c3_72 = arith.constant 3 : index
      %c1_73 = arith.constant 1 : index
      %107 = memref.load %arg2[%c3_72, %c1_73] : memref<8x8xi32, #tpu.memory_space<smem>>
      %108 = arith.index_cast %107 : i32 to index
      %c0_74 = arith.constant 0 : index
      %109 = vector.load %arg6[%108, %c0_74] : memref<256x32xf32, #tpu.memory_space<vmem>>, vector<1x32xf32>
      %110 = arith.addf %106, %109 : vector<1x32xf32>
      %c3_75 = arith.constant 3 : index
      %c2_76 = arith.constant 2 : index
      %111 = memref.load %arg2[%c3_75, %c2_76] : memref<8x8xi32, #tpu.memory_space<smem>>
      %112 = arith.index_cast %111 : i32 to index
      %c0_77 = arith.constant 0 : index
      %113 = vector.load %arg6[%112, %c0_77] : memref<256x32xf32, #tpu.memory_space<vmem>>, vector<1x32xf32>
      %114 = arith.addf %110, %113 : vector<1x32xf32>
      %c3_78 = arith.constant 3 : index
      %c3_79 = arith.constant 3 : index
      %115 = memref.load %arg2[%c3_78, %c3_79] : memref<8x8xi32, #tpu.memory_space<smem>>
      %116 = arith.index_cast %115 : i32 to index
      %c0_80 = arith.constant 0 : index
      %117 = vector.load %arg6[%116, %c0_80] : memref<256x32xf32, #tpu.memory_space<vmem>>, vector<1x32xf32>
      %118 = arith.addf %114, %117 : vector<1x32xf32>
      %c3_81 = arith.constant 3 : index
      %c4_82 = arith.constant 4 : index
      %119 = memref.load %arg2[%c3_81, %c4_82] : memref<8x8xi32, #tpu.memory_space<smem>>
      %120 = arith.index_cast %119 : i32 to index
      %c0_83 = arith.constant 0 : index
      %121 = vector.load %arg6[%120, %c0_83] : memref<256x32xf32, #tpu.memory_space<vmem>>, vector<1x32xf32>
      %122 = arith.addf %118, %121 : vector<1x32xf32>
      %c3_84 = arith.constant 3 : index
      %c5_85 = arith.constant 5 : index
      %123 = memref.load %arg2[%c3_84, %c5_85] : memref<8x8xi32, #tpu.memory_space<smem>>
      %124 = arith.index_cast %123 : i32 to index
      %c0_86 = arith.constant 0 : index
      %125 = vector.load %arg6[%124, %c0_86] : memref<256x32xf32, #tpu.memory_space<vmem>>, vector<1x32xf32>
      %126 = arith.addf %122, %125 : vector<1x32xf32>
      %c3_87 = arith.constant 3 : index
      %c6_88 = arith.constant 6 : index
      %127 = memref.load %arg2[%c3_87, %c6_88] : memref<8x8xi32, #tpu.memory_space<smem>>
      %128 = arith.index_cast %127 : i32 to index
      %c0_89 = arith.constant 0 : index
      %129 = vector.load %arg6[%128, %c0_89] : memref<256x32xf32, #tpu.memory_space<vmem>>, vector<1x32xf32>
      %130 = arith.addf %126, %129 : vector<1x32xf32>
      %c3_90 = arith.constant 3 : index
      %c7_91 = arith.constant 7 : index
      %131 = memref.load %arg2[%c3_90, %c7_91] : memref<8x8xi32, #tpu.memory_space<smem>>
      %132 = arith.index_cast %131 : i32 to index
      %c0_92 = arith.constant 0 : index
      %133 = vector.load %arg6[%132, %c0_92] : memref<256x32xf32, #tpu.memory_space<vmem>>, vector<1x32xf32>
      %134 = arith.addf %130, %133 : vector<1x32xf32>
      %c4_93 = arith.constant 4 : index
      %c0_94 = arith.constant 0 : index
      %135 = memref.load %arg2[%c4_93, %c0_94] : memref<8x8xi32, #tpu.memory_space<smem>>
      %136 = arith.index_cast %135 : i32 to index
      %c0_95 = arith.constant 0 : index
      %137 = vector.load %arg6[%136, %c0_95] : memref<256x32xf32, #tpu.memory_space<vmem>>, vector<1x32xf32>
      %c4_96 = arith.constant 4 : index
      %c1_97 = arith.constant 1 : index
      %138 = memref.load %arg2[%c4_96, %c1_97] : memref<8x8xi32, #tpu.memory_space<smem>>
      %139 = arith.index_cast %138 : i32 to index
      %c0_98 = arith.constant 0 : index
      %140 = vector.load %arg6[%139, %c0_98] : memref<256x32xf32, #tpu.memory_space<vmem>>, vector<1x32xf32>
      %141 = arith.addf %137, %140 : vector<1x32xf32>
      %c4_99 = arith.constant 4 : index
      %c2_100 = arith.constant 2 : index
      %142 = memref.load %arg2[%c4_99, %c2_100] : memref<8x8xi32, #tpu.memory_space<smem>>
      %143 = arith.index_cast %142 : i32 to index
      %c0_101 = arith.constant 0 : index
      %144 = vector.load %arg6[%143, %c0_101] : memref<256x32xf32, #tpu.memory_space<vmem>>, vector<1x32xf32>
      %145 = arith.addf %141, %144 : vector<1x32xf32>
      %c4_102 = arith.constant 4 : index
      %c3_103 = arith.constant 3 : index
      %146 = memref.load %arg2[%c4_102, %c3_103] : memref<8x8xi32, #tpu.memory_space<smem>>
      %147 = arith.index_cast %146 : i32 to index
      %c0_104 = arith.constant 0 : index
      %148 = vector.load %arg6[%147, %c0_104] : memref<256x32xf32, #tpu.memory_space<vmem>>, vector<1x32xf32>
      %149 = arith.addf %145, %148 : vector<1x32xf32>
      %c4_105 = arith.constant 4 : index
      %c4_106 = arith.constant 4 : index
      %150 = memref.load %arg2[%c4_105, %c4_106] : memref<8x8xi32, #tpu.memory_space<smem>>
      %151 = arith.index_cast %150 : i32 to index
      %c0_107 = arith.constant 0 : index
      %152 = vector.load %arg6[%151, %c0_107] : memref<256x32xf32, #tpu.memory_space<vmem>>, vector<1x32xf32>
      %153 = arith.addf %149, %152 : vector<1x32xf32>
      %c4_108 = arith.constant 4 : index
      %c5_109 = arith.constant 5 : index
      %154 = memref.load %arg2[%c4_108, %c5_109] : memref<8x8xi32, #tpu.memory_space<smem>>
      %155 = arith.index_cast %154 : i32 to index
      %c0_110 = arith.constant 0 : index
      %156 = vector.load %arg6[%155, %c0_110] : memref<256x32xf32, #tpu.memory_space<vmem>>, vector<1x32xf32>
      %157 = arith.addf %153, %156 : vector<1x32xf32>
      %c4_111 = arith.constant 4 : index
      %c6_112 = arith.constant 6 : index
      %158 = memref.load %arg2[%c4_111, %c6_112] : memref<8x8xi32, #tpu.memory_space<smem>>
      %159 = arith.index_cast %158 : i32 to index
      %c0_113 = arith.constant 0 : index
      %160 = vector.load %arg6[%159, %c0_113] : memref<256x32xf32, #tpu.memory_space<vmem>>, vector<1x32xf32>
      %161 = arith.addf %157, %160 : vector<1x32xf32>
      %c4_114 = arith.constant 4 : index
      %c7_115 = arith.constant 7 : index
      %162 = memref.load %arg2[%c4_114, %c7_115] : memref<8x8xi32, #tpu.memory_space<smem>>
      %163 = arith.index_cast %162 : i32 to index
      %c0_116 = arith.constant 0 : index
      %164 = vector.load %arg6[%163, %c0_116] : memref<256x32xf32, #tpu.memory_space<vmem>>, vector<1x32xf32>
      %165 = arith.addf %161, %164 : vector<1x32xf32>
      %c5_117 = arith.constant 5 : index
      %c0_118 = arith.constant 0 : index
      %166 = memref.load %arg2[%c5_117, %c0_118] : memref<8x8xi32, #tpu.memory_space<smem>>
      %167 = arith.index_cast %166 : i32 to index
      %c0_119 = arith.constant 0 : index
      %168 = vector.load %arg6[%167, %c0_119] : memref<256x32xf32, #tpu.memory_space<vmem>>, vector<1x32xf32>
      %c5_120 = arith.constant 5 : index
      %c1_121 = arith.constant 1 : index
      %169 = memref.load %arg2[%c5_120, %c1_121] : memref<8x8xi32, #tpu.memory_space<smem>>
      %170 = arith.index_cast %169 : i32 to index
      %c0_122 = arith.constant 0 : index
      %171 = vector.load %arg6[%170, %c0_122] : memref<256x32xf32, #tpu.memory_space<vmem>>, vector<1x32xf32>
      %172 = arith.addf %168, %171 : vector<1x32xf32>
      %c5_123 = arith.constant 5 : index
      %c2_124 = arith.constant 2 : index
      %173 = memref.load %arg2[%c5_123, %c2_124] : memref<8x8xi32, #tpu.memory_space<smem>>
      %174 = arith.index_cast %173 : i32 to index
      %c0_125 = arith.constant 0 : index
      %175 = vector.load %arg6[%174, %c0_125] : memref<256x32xf32, #tpu.memory_space<vmem>>, vector<1x32xf32>
      %176 = arith.addf %172, %175 : vector<1x32xf32>
      %c5_126 = arith.constant 5 : index
      %c3_127 = arith.constant 3 : index
      %177 = memref.load %arg2[%c5_126, %c3_127] : memref<8x8xi32, #tpu.memory_space<smem>>
      %178 = arith.index_cast %177 : i32 to index
      %c0_128 = arith.constant 0 : index
      %179 = vector.load %arg6[%178, %c0_128] : memref<256x32xf32, #tpu.memory_space<vmem>>, vector<1x32xf32>
      %180 = arith.addf %176, %179 : vector<1x32xf32>
      %c5_129 = arith.constant 5 : index
      %c4_130 = arith.constant 4 : index
      %181 = memref.load %arg2[%c5_129, %c4_130] : memref<8x8xi32, #tpu.memory_space<smem>>
      %182 = arith.index_cast %181 : i32 to index
      %c0_131 = arith.constant 0 : index
      %183 = vector.load %arg6[%182, %c0_131] : memref<256x32xf32, #tpu.memory_space<vmem>>, vector<1x32xf32>
      %184 = arith.addf %180, %183 : vector<1x32xf32>
      %c5_132 = arith.constant 5 : index
      %c5_133 = arith.constant 5 : index
      %185 = memref.load %arg2[%c5_132, %c5_133] : memref<8x8xi32, #tpu.memory_space<smem>>
      %186 = arith.index_cast %185 : i32 to index
      %c0_134 = arith.constant 0 : index
      %187 = vector.load %arg6[%186, %c0_134] : memref<256x32xf32, #tpu.memory_space<vmem>>, vector<1x32xf32>
      %188 = arith.addf %184, %187 : vector<1x32xf32>
      %c5_135 = arith.constant 5 : index
      %c6_136 = arith.constant 6 : index
      %189 = memref.load %arg2[%c5_135, %c6_136] : memref<8x8xi32, #tpu.memory_space<smem>>
      %190 = arith.index_cast %189 : i32 to index
      %c0_137 = arith.constant 0 : index
      %191 = vector.load %arg6[%190, %c0_137] : memref<256x32xf32, #tpu.memory_space<vmem>>, vector<1x32xf32>
      %192 = arith.addf %188, %191 : vector<1x32xf32>
      %c5_138 = arith.constant 5 : index
      %c7_139 = arith.constant 7 : index
      %193 = memref.load %arg2[%c5_138, %c7_139] : memref<8x8xi32, #tpu.memory_space<smem>>
      %194 = arith.index_cast %193 : i32 to index
      %c0_140 = arith.constant 0 : index
      %195 = vector.load %arg6[%194, %c0_140] : memref<256x32xf32, #tpu.memory_space<vmem>>, vector<1x32xf32>
      %196 = arith.addf %192, %195 : vector<1x32xf32>
      %c6_141 = arith.constant 6 : index
      %c0_142 = arith.constant 0 : index
      %197 = memref.load %arg2[%c6_141, %c0_142] : memref<8x8xi32, #tpu.memory_space<smem>>
      %198 = arith.index_cast %197 : i32 to index
      %c0_143 = arith.constant 0 : index
      %199 = vector.load %arg6[%198, %c0_143] : memref<256x32xf32, #tpu.memory_space<vmem>>, vector<1x32xf32>
      %c6_144 = arith.constant 6 : index
      %c1_145 = arith.constant 1 : index
      %200 = memref.load %arg2[%c6_144, %c1_145] : memref<8x8xi32, #tpu.memory_space<smem>>
      %201 = arith.index_cast %200 : i32 to index
      %c0_146 = arith.constant 0 : index
      %202 = vector.load %arg6[%201, %c0_146] : memref<256x32xf32, #tpu.memory_space<vmem>>, vector<1x32xf32>
      %203 = arith.addf %199, %202 : vector<1x32xf32>
      %c6_147 = arith.constant 6 : index
      %c2_148 = arith.constant 2 : index
      %204 = memref.load %arg2[%c6_147, %c2_148] : memref<8x8xi32, #tpu.memory_space<smem>>
      %205 = arith.index_cast %204 : i32 to index
      %c0_149 = arith.constant 0 : index
      %206 = vector.load %arg6[%205, %c0_149] : memref<256x32xf32, #tpu.memory_space<vmem>>, vector<1x32xf32>
      %207 = arith.addf %203, %206 : vector<1x32xf32>
      %c6_150 = arith.constant 6 : index
      %c3_151 = arith.constant 3 : index
      %208 = memref.load %arg2[%c6_150, %c3_151] : memref<8x8xi32, #tpu.memory_space<smem>>
      %209 = arith.index_cast %208 : i32 to index
      %c0_152 = arith.constant 0 : index
      %210 = vector.load %arg6[%209, %c0_152] : memref<256x32xf32, #tpu.memory_space<vmem>>, vector<1x32xf32>
      %211 = arith.addf %207, %210 : vector<1x32xf32>
      %c6_153 = arith.constant 6 : index
      %c4_154 = arith.constant 4 : index
      %212 = memref.load %arg2[%c6_153, %c4_154] : memref<8x8xi32, #tpu.memory_space<smem>>
      %213 = arith.index_cast %212 : i32 to index
      %c0_155 = arith.constant 0 : index
      %214 = vector.load %arg6[%213, %c0_155] : memref<256x32xf32, #tpu.memory_space<vmem>>, vector<1x32xf32>
      %215 = arith.addf %211, %214 : vector<1x32xf32>
      %c6_156 = arith.constant 6 : index
      %c5_157 = arith.constant 5 : index
      %216 = memref.load %arg2[%c6_156, %c5_157] : memref<8x8xi32, #tpu.memory_space<smem>>
      %217 = arith.index_cast %216 : i32 to index
      %c0_158 = arith.constant 0 : index
      %218 = vector.load %arg6[%217, %c0_158] : memref<256x32xf32, #tpu.memory_space<vmem>>, vector<1x32xf32>
      %219 = arith.addf %215, %218 : vector<1x32xf32>
      %c6_159 = arith.constant 6 : index
      %c6_160 = arith.constant 6 : index
      %220 = memref.load %arg2[%c6_159, %c6_160] : memref<8x8xi32, #tpu.memory_space<smem>>
      %221 = arith.index_cast %220 : i32 to index
      %c0_161 = arith.constant 0 : index
      %222 = vector.load %arg6[%221, %c0_161] : memref<256x32xf32, #tpu.memory_space<vmem>>, vector<1x32xf32>
      %223 = arith.addf %219, %222 : vector<1x32xf32>
      %c6_162 = arith.constant 6 : index
      %c7_163 = arith.constant 7 : index
      %224 = memref.load %arg2[%c6_162, %c7_163] : memref<8x8xi32, #tpu.memory_space<smem>>
      %225 = arith.index_cast %224 : i32 to index
      %c0_164 = arith.constant 0 : index
      %226 = vector.load %arg6[%225, %c0_164] : memref<256x32xf32, #tpu.memory_space<vmem>>, vector<1x32xf32>
      %227 = arith.addf %223, %226 : vector<1x32xf32>
      %c7_165 = arith.constant 7 : index
      %c0_166 = arith.constant 0 : index
      %228 = memref.load %arg2[%c7_165, %c0_166] : memref<8x8xi32, #tpu.memory_space<smem>>
      %229 = arith.index_cast %228 : i32 to index
      %c0_167 = arith.constant 0 : index
      %230 = vector.load %arg6[%229, %c0_167] : memref<256x32xf32, #tpu.memory_space<vmem>>, vector<1x32xf32>
      %c7_168 = arith.constant 7 : index
      %c1_169 = arith.constant 1 : index
      %231 = memref.load %arg2[%c7_168, %c1_169] : memref<8x8xi32, #tpu.memory_space<smem>>
      %232 = arith.index_cast %231 : i32 to index
      %c0_170 = arith.constant 0 : index
      %233 = vector.load %arg6[%232, %c0_170] : memref<256x32xf32, #tpu.memory_space<vmem>>, vector<1x32xf32>
      %234 = arith.addf %230, %233 : vector<1x32xf32>
      %c7_171 = arith.constant 7 : index
      %c2_172 = arith.constant 2 : index
      %235 = memref.load %arg2[%c7_171, %c2_172] : memref<8x8xi32, #tpu.memory_space<smem>>
      %236 = arith.index_cast %235 : i32 to index
      %c0_173 = arith.constant 0 : index
      %237 = vector.load %arg6[%236, %c0_173] : memref<256x32xf32, #tpu.memory_space<vmem>>, vector<1x32xf32>
      %238 = arith.addf %234, %237 : vector<1x32xf32>
      %c7_174 = arith.constant 7 : index
      %c3_175 = arith.constant 3 : index
      %239 = memref.load %arg2[%c7_174, %c3_175] : memref<8x8xi32, #tpu.memory_space<smem>>
      %240 = arith.index_cast %239 : i32 to index
      %c0_176 = arith.constant 0 : index
      %241 = vector.load %arg6[%240, %c0_176] : memref<256x32xf32, #tpu.memory_space<vmem>>, vector<1x32xf32>
      %242 = arith.addf %238, %241 : vector<1x32xf32>
      %c7_177 = arith.constant 7 : index
      %c4_178 = arith.constant 4 : index
      %243 = memref.load %arg2[%c7_177, %c4_178] : memref<8x8xi32, #tpu.memory_space<smem>>
      %244 = arith.index_cast %243 : i32 to index
      %c0_179 = arith.constant 0 : index
      %245 = vector.load %arg6[%244, %c0_179] : memref<256x32xf32, #tpu.memory_space<vmem>>, vector<1x32xf32>
      %246 = arith.addf %242, %245 : vector<1x32xf32>
      %c7_180 = arith.constant 7 : index
      %c5_181 = arith.constant 5 : index
      %247 = memref.load %arg2[%c7_180, %c5_181] : memref<8x8xi32, #tpu.memory_space<smem>>
      %248 = arith.index_cast %247 : i32 to index
      %c0_182 = arith.constant 0 : index
      %249 = vector.load %arg6[%248, %c0_182] : memref<256x32xf32, #tpu.memory_space<vmem>>, vector<1x32xf32>
      %250 = arith.addf %246, %249 : vector<1x32xf32>
      %c7_183 = arith.constant 7 : index
      %c6_184 = arith.constant 6 : index
      %251 = memref.load %arg2[%c7_183, %c6_184] : memref<8x8xi32, #tpu.memory_space<smem>>
      %252 = arith.index_cast %251 : i32 to index
      %c0_185 = arith.constant 0 : index
      %253 = vector.load %arg6[%252, %c0_185] : memref<256x32xf32, #tpu.memory_space<vmem>>, vector<1x32xf32>
      %254 = arith.addf %250, %253 : vector<1x32xf32>
      %c7_186 = arith.constant 7 : index
      %c7_187 = arith.constant 7 : index
      %255 = memref.load %arg2[%c7_186, %c7_187] : memref<8x8xi32, #tpu.memory_space<smem>>
      %256 = arith.index_cast %255 : i32 to index
      %c0_188 = arith.constant 0 : index
      %257 = vector.load %arg6[%256, %c0_188] : memref<256x32xf32, #tpu.memory_space<vmem>>, vector<1x32xf32>
      %258 = arith.addf %254, %257 : vector<1x32xf32>
      %259 = tpu.concatenate %41, %72, %103, %134, %165, %196, %227, %258 in 0 : vector<1x32xf32>, vector<1x32xf32>, vector<1x32xf32>, vector<1x32xf32>, vector<1x32xf32>, vector<1x32xf32>, vector<1x32xf32>, vector<1x32xf32> -> vector<8x32xf32>
      %cst = arith.constant 1.250000e-01 : f32
      %260 = vector.broadcast %cst : f32 to vector<8x32xf32>
      %261 = arith.mulf %259, %260 : vector<8x32xf32>
      %c0_189 = arith.constant 0 : index
      %c0_190 = arith.constant 0 : index
      %262 = vector.load %arg7[%c0_189, %c0_190] : memref<8x32xf32, #tpu.memory_space<vmem>>, vector<8x32xf32>
      tpu.vector_store %arg7[%c0_189, %c0_190], %261 {strides = array<i32>} : memref<8x32xf32, #tpu.memory_space<vmem>>, vector<8x32xf32>,
      %cst_191 = arith.constant 0xFF800000 : f32
      %263 = vector.broadcast %cst_191 : f32 to vector<8x1xf32>
      %c0_192 = arith.constant 0 : index
      %c0_193 = arith.constant 0 : index
      %264 = vector.load %arg8[%c0_192, %c0_193] : memref<8x1xf32, #tpu.memory_space<vmem>>, vector<8x1xf32>
      tpu.vector_store %arg8[%c0_192, %c0_193], %263 {strides = array<i32>} : memref<8x1xf32, #tpu.memory_space<vmem>>, vector<8x1xf32>,
      %cst_194 = arith.constant 0.000000e+00 : f32
      %265 = vector.broadcast %cst_194 : f32 to vector<8x1xf32>
      %c0_195 = arith.constant 0 : index
      %c0_196 = arith.constant 0 : index
      %266 = vector.load %arg9[%c0_195, %c0_196] : memref<8x1xf32, #tpu.memory_space<vmem>>, vector<8x1xf32>
      tpu.vector_store %arg9[%c0_195, %c0_196], %265 {strides = array<i32>} : memref<8x1xf32, #tpu.memory_space<vmem>>, vector<8x1xf32>,
    } else {
    }
    %c0_i32_2 = arith.constant 0 : i32
    %5 = arith.cmpi eq, %arg0, %c0_i32_2 : i32
    %6 = arith.extui %5 : i1 to i32
    %c0_i32_3 = arith.constant 0 : i32
    %7 = arith.cmpi ne, %6, %c0_i32_3 : i32
    scf.if %7 {
      %c0 = arith.constant 0 : index
      %c0_5 = arith.constant 0 : index
      %11 = vector.load %arg7[%c0, %c0_5] : memref<8x32xf32, #tpu.memory_space<vmem>>, vector<8x32xf32>
      %c0_6 = arith.constant 0 : index
      %c0_7 = arith.constant 0 : index
      %12 = vector.load %arg4[%c0_6, %c0_7] : memref<256x32xf32, #tpu.memory_space<vmem>>, vector<256x32xf32>
      %cst = arith.constant dense<0.000000e+00> : vector<8x256xf32>
      %13 = tpu.matmul %11, %12, %cst {dimension_numbers = #tpu.dot_dimension_numbers<[1], [1], [0], [0], [0, 0, 1, 0], [], []>} : vector<8x32xf32>, vector<256x32xf32>, vector<8x256xf32> -> vector<8x256xf32>
      %14 = arith.index_cast %arg1 : i32 to index
      %c0_8 = arith.constant 0 : index
      %c0_9 = arith.constant 0 : index
      %15 = vector.load %arg10[%14, %c0_8, %c0_9] : memref<1x8x256xf32, #tpu.memory_space<vmem>>, vector<1x8x256xf32>
      %16 = vector.shape_cast %15 : vector<1x8x256xf32> to vector<8x256xf32>
      %17 = vector.shape_cast %13 : vector<8x256xf32> to vector<1x8x256xf32>
      tpu.vector_store %arg10[%14, %c0_8, %c0_9], %17 {strides = array<i32>} : memref<1x8x256xf32, #tpu.memory_space<vmem>>, vector<1x8x256xf32>,
      %c0_10 = arith.constant 0 : index
      %c0_11 = arith.constant 0 : index
      %18 = vector.load %arg8[%c0_10, %c0_11] : memref<8x1xf32, #tpu.memory_space<vmem>>, vector<8x1xf32>
      %cst_12 = arith.constant dense<0xFF800000> : vector<8xf32>
      %19 = vector.multi_reduction <maximumf>, %13, %cst_12 [1] : vector<8x256xf32> to vector<8xf32>
      %20 = vector.shape_cast %19 : vector<8xf32> to vector<8x1xf32>
      %21 = arith.maximumf %18, %20 : vector<8x1xf32>
      %c0_13 = arith.constant 0 : index
      %c0_14 = arith.constant 0 : index
      %22 = vector.load %arg9[%c0_13, %c0_14] : memref<8x1xf32, #tpu.memory_space<vmem>>, vector<8x1xf32>
      %23 = arith.subf %18, %21 : vector<8x1xf32>
      %24 = math.exp %23 : vector<8x1xf32>
      %25 = arith.mulf %22, %24 : vector<8x1xf32>
      %26 = vector.broadcast %21 : vector<8x1xf32> to vector<8x256xf32>
      %27 = arith.subf %13, %26 : vector<8x256xf32>
      %28 = math.exp %27 : vector<8x256xf32>
      %cst_15 = arith.constant dense<0.000000e+00> : vector<8xf32>
      %29 = vector.multi_reduction <add>, %28, %cst_15 [1] : vector<8x256xf32> to vector<8xf32>
      %30 = vector.shape_cast %29 : vector<8xf32> to vector<8x1xf32>
      %31 = arith.addf %25, %30 : vector<8x1xf32>
      %c0_16 = arith.constant 0 : index
      %c0_17 = arith.constant 0 : index
      %32 = vector.load %arg9[%c0_16, %c0_17] : memref<8x1xf32, #tpu.memory_space<vmem>>, vector<8x1xf32>
      tpu.vector_store %arg9[%c0_16, %c0_17], %31 {strides = array<i32>} : memref<8x1xf32, #tpu.memory_space<vmem>>, vector<8x1xf32>,
      %c0_18 = arith.constant 0 : index
      %c0_19 = arith.constant 0 : index
      %33 = vector.load %arg8[%c0_18, %c0_19] : memref<8x1xf32, #tpu.memory_space<vmem>>, vector<8x1xf32>
      tpu.vector_store %arg8[%c0_18, %c0_19], %21 {strides = array<i32>} : memref<8x1xf32, #tpu.memory_space<vmem>>, vector<8x1xf32>,
    } else {
    }
    %c1_i32 = arith.constant 1 : i32
    %8 = arith.cmpi eq, %arg0, %c1_i32 : i32
    %9 = arith.extui %8 : i1 to i32
    %c0_i32_4 = arith.constant 0 : i32
    %10 = arith.cmpi ne, %9, %c0_i32_4 : i32
    scf.if %10 {
      %c0 = arith.constant 0 : index
      %c0_5 = arith.constant 0 : index
      %11 = vector.load %arg8[%c0, %c0_5] : memref<8x1xf32, #tpu.memory_space<vmem>>, vector<8x1xf32>
      %c0_6 = arith.constant 0 : index
      %c0_7 = arith.constant 0 : index
      %12 = vector.load %arg9[%c0_6, %c0_7] : memref<8x1xf32, #tpu.memory_space<vmem>>, vector<8x1xf32>
      %13 = math.log %12 : vector<8x1xf32>
      %14 = arith.addf %11, %13 : vector<8x1xf32>
      %15 = arith.index_cast %arg1 : i32 to index
      %c0_8 = arith.constant 0 : index
      %c0_9 = arith.constant 0 : index
      %16 = vector.load %arg10[%15, %c0_8, %c0_9] : memref<1x8x256xf32, #tpu.memory_space<vmem>>, vector<1x8x256xf32>
      %17 = vector.shape_cast %16 : vector<1x8x256xf32> to vector<8x256xf32>
      %18 = vector.broadcast %14 : vector<8x1xf32> to vector<8x256xf32>
      %19 = arith.subf %17, %18 : vector<8x256xf32>
      %c0_10 = arith.constant 0 : index
      %c0_11 = arith.constant 0 : index
      %20 = vector.load %arg5[%c0_10, %c0_11] : memref<8x256xf32, #tpu.memory_space<vmem>>, vector<8x256xf32>
      tpu.vector_store %arg5[%c0_10, %c0_11], %19 {strides = array<i32>} : memref<8x256xf32, #tpu.memory_space<vmem>>, vector<8x256xf32>,
    } else {
    }
    return
  }
  func.func @transform_1(%arg0: i32, %arg1: i32, %arg2: memref<8x8xi32, #tpu.memory_space<smem>>) -> (i32, i32) {
    %c1_i32 = arith.constant 1 : i32
    %0 = arith.subi %c1_i32, %arg0 : i32
    %1 = arith.muli %0, %arg1 : i32
    %c0_i32 = arith.constant 0 : i32
    %2 = arith.muli %arg0, %c0_i32 : i32
    %3 = arith.addi %1, %2 : i32
    %c0_i32_0 = arith.constant 0 : i32
    %c0_i32_1 = arith.constant 0 : i32
    return %3, %c0_i32_0 : i32, i32
  }
  func.func @transform_2(%arg0: i32, %arg1: i32, %arg2: memref<8x8xi32, #tpu.memory_space<smem>>) -> (i32, i32) {
    %0 = arith.muli %arg0, %arg1 : i32
    %c0_i32 = arith.constant 0 : i32
    %c0_i32_0 = arith.constant 0 : i32
    return %c0_i32, %0 : i32, i32
  }
}

</mosaic_0001>

<bundles_post_ra>
// kernel: tpu_custom_call.1
= control target key start
LH: loop header
LB: loop body
LE: loop exit
PB: predicated region body
PF: predicated region fallthrough
CT: control target
= control target key end

     0   :  { %s1793_s0 = inlined_call_operand.vmem [shape: s32[8,8], index: 0, kind: input, shape index: {}]   ;;  %s1794_s1 = inlined_call_operand.vmem [shape: f32[256,32], index: 1, kind: input, shape index: {}]   ;;  %s1795_s2 = inlined_call_operand.vmem [shape: f32[256,32], index: 2, kind: input, shape index: {}]   ;;  %s1796_s3 = inlined_call_operand.hbm [shape: f32[8,256], index: 3, kind: output, shape index: {}]  }
   0x1   :  { %1803 = sst [smem:[#allocation25_spill]] %s1794_s1  ;;  %s8_s14 = sshll.u32 %s1793_s0, 4  ;;  %s9_s14 = int_to_ptr.vmem [resolvable:$true] %s8_s14 }
   0x2   :  { %1804 = sst [smem:[#allocation26_spill]] %s1795_s2  ;;  %s1229_s15 = scalar_lea.vmem %s9_s14, 128 }
   0x3   :  { %1805 = sst [smem:[#allocation27_spill]] %s1796_s3  ;;  %p1230_p0 = scmp.ne.s32.totalorder %s9_s14, %s1229_s15 }
   0x4   :  { %p1234_p1 = scmp.lt.s32.totalorder %s9_s14, %s9_s14  ;;  %p1235_p2 = scmp.lt.s32.totalorder %s1229_s15, %s1229_s15 }
   0x6   :  { %p1236_p3 = por %p1235_p2, %p1234_p1 }
   0x8   :  { %p1237_p4 = pnand %p1236_p3, %p1230_p0 }
   0xa   :  { %1240 = shalt.err (!%p1237_p4)  }
   0xb   :  { %s1299_s16 = smov [#allocation9]  }
   0xc   :  { %11 = dma.vmem_to_smem %s9_s14, 128, %s1299_s16, [#allocation8] }
   0xd   :  { %1279 = dma.done.wait [#allocation8], 128 }
   0xe   :  { %1280 = vsyncadd [#allocation8], 4294967168 }
   0xf   :  { %13 = sfence }
  0x10   :  { %14 = vsyncpa [#allocation11], 0 }
  0x11   :  { %16 = vsyncpa [#allocation11 + $0x1], 0  ;;  %s1328_s17 = smov 0   ;;  %s1330_s18 = smov 0  }
  0x12   :  { %s1332_s0 = smov 0  }
  0x13 LB: > { %1806 = sst [smem:[#allocation16_spill]] %s1289_s17  ;;  %s34_s21 = sadd.s32 1, %s1293_s18  ;;  %s1297_s0 = sphi %s1332_s0, %s22_s0   ;;  %s1293_s18 = sphi %s1330_s18, %s1833_s18   ;;  %s1289_s17 = sphi %s1328_s17, %s1832_s17  }
  0x14   : > { %1807 = sst [smem:[#allocation17_spill]] %s1293_s18  ;;  %p990_p5 = scmp.ge.s32.totalorder %s1297_s0, 1 }
  0x15   : > { %1808 = sst [smem:[#allocation18_spill]] %s1297_s0  ;;  %p36_p6 = scmp.ge.s32.totalorder %s34_s21, 2 }
  0x16   : > { %p121_p7 = scmp.lt.s32.totalorder %s1297_s0, 3 }
  0x17   : > { %s1835_s21 = smov (%p36_p6, %s34_s21), 0 }
  0x18   : > { %1809 = sst [smem:[#allocation19_spill]] %s1835_s21  ;;  %p122_p8 = pnand %p990_p5, %p121_p7 }
  0x19   : > { %p155_p9 = scmp.eq.s32.totalorder (!%p122_p8), %s1289_s17, 0 }
  0x1a   : > { %125 = sbr.rel (%p122_p8) target bundleno = 1075 (0x433), region = 24 }
  0x21   : > { %160 = sbr.rel (!%p155_p9) target bundleno = 158 (0x9e), region = 28 }
  0x28   : > { %s1810_s1 = sld [smem:[#allocation25_spill]] }
  0x2e   : > { %v193_v0 = vld [vmem:[%s1810_s1] sm:$0xff]  ;;  %v195_v1 = vld [vmem:[%s1810_s1 + $0x8] sm:$0xff]  ;;  %v197_v2 = vld [vmem:[%s1810_s1 + $0x10] sm:$0xff] }
  0x2f   : > { %194 = vst [vmem:[#allocation2] sm:$0xff] %v193_v0  ;;  %196 = vst [vmem:[#allocation2 + $0x8] sm:$0xff] %v195_v1  ;;  %v199_v3 = vld [vmem:[%s1810_s1 + $0x18] sm:$0xff]  ;;  %v201_v4 = vld [vmem:[%s1810_s1 + $0x20] sm:$0xff] }
  0x30   : > { %198 = vst [vmem:[#allocation2 + $0x10] sm:$0xff] %v197_v2  ;;  %v203_v5 = vld [vmem:[%s1810_s1 + $0x28] sm:$0xff]  ;;  %200 = vst [vmem:[#allocation2 + $0x18] sm:$0xff] %v199_v3  ;;  %v205_v6 = vld [vmem:[%s1810_s1 + $0x30] sm:$0xff] }
  0x31   : > { %202 = vst [vmem:[#allocation2 + $0x20] sm:$0xff] %v201_v4  ;;  %204 = vst [vmem:[#allocation2 + $0x28] sm:$0xff] %v203_v5  ;;  %v207_v7 = vld [vmem:[%s1810_s1 + $0x38] sm:$0xff]  ;;  %v209_v8 = vld [vmem:[%s1810_s1 + $0x40] sm:$0xff] }
  0x32   : > { %206 = vst [vmem:[#allocation2 + $0x30] sm:$0xff] %v205_v6  ;;  %208 = vst [vmem:[#allocation2 + $0x38] sm:$0xff] %v207_v7  ;;  %v211_v9 = vld [vmem:[%s1810_s1 + $0x48] sm:$0xff]  ;;  %v213_v10 = vld [vmem:[%s1810_s1 + $0x50] sm:$0xff] }
  0x33   : > { %210 = vst [vmem:[#allocation2 + $0x40] sm:$0xff] %v209_v8  ;;  %v215_v11 = vld [vmem:[%s1810_s1 + $0x58] sm:$0xff]  ;;  %212 = vst [vmem:[#allocation2 + $0x48] sm:$0xff] %v211_v9  ;;  %v217_v12 = vld [vmem:[%s1810_s1 + $0x60] sm:$0xff] }
  0x34   : > { %214 = vst [vmem:[#allocation2 + $0x50] sm:$0xff] %v213_v10  ;;  %216 = vst [vmem:[#allocation2 + $0x58] sm:$0xff] %v215_v11  ;;  %v219_v13 = vld [vmem:[%s1810_s1 + $0x68] sm:$0xff]  ;;  %v221_v14 = vld [vmem:[%s1810_s1 + $0x70] sm:$0xff] }
  0x35   : > { %218 = vst [vmem:[#allocation2 + $0x60] sm:$0xff] %v217_v12  ;;  %220 = vst [vmem:[#allocation2 + $0x68] sm:$0xff] %v219_v13  ;;  %v223_v15 = vld [vmem:[%s1810_s1 + $0x78] sm:$0xff]  ;;  %v225_v16 = vld [vmem:[%s1810_s1 + $0x80] sm:$0xff] }
  0x36   : > { %222 = vst [vmem:[#allocation2 + $0x70] sm:$0xff] %v221_v14  ;;  %v227_v17 = vld [vmem:[%s1810_s1 + $0x88] sm:$0xff]  ;;  %224 = vst [vmem:[#allocation2 + $0x78] sm:$0xff] %v223_v15  ;;  %v229_v18 = vld [vmem:[%s1810_s1 + $0x90] sm:$0xff] }
  0x37   : > { %226 = vst [vmem:[#allocation2 + $0x80] sm:$0xff] %v225_v16  ;;  %228 = vst [vmem:[#allocation2 + $0x88] sm:$0xff] %v227_v17  ;;  %v231_v19 = vld [vmem:[%s1810_s1 + $0x98] sm:$0xff]  ;;  %v233_v20 = vld [vmem:[%s1810_s1 + $0xa0] sm:$0xff] }
  0x38   : > { %230 = vst [vmem:[#allocation2 + $0x90] sm:$0xff] %v229_v18  ;;  %232 = vst [vmem:[#allocation2 + $0x98] sm:$0xff] %v231_v19  ;;  %v235_v21 = vld [vmem:[%s1810_s1 + $0xa8] sm:$0xff]  ;;  %v237_v22 = vld [vmem:[%s1810_s1 + $0xb0] sm:$0xff] }
  0x39   : > { %234 = vst [vmem:[#allocation2 + $0xa0] sm:$0xff] %v233_v20  ;;  %v239_v23 = vld [vmem:[%s1810_s1 + $0xb8] sm:$0xff]  ;;  %236 = vst [vmem:[#allocation2 + $0xa8] sm:$0xff] %v235_v21  ;;  %v241_v24 = vld [vmem:[%s1810_s1 + $0xc0] sm:$0xff] }
  0x3a   : > { %238 = vst [vmem:[#allocation2 + $0xb0] sm:$0xff] %v237_v22  ;;  %240 = vst [vmem:[#allocation2 + $0xb8] sm:$0xff] %v239_v23  ;;  %v243_v25 = vld [vmem:[%s1810_s1 + $0xc8] sm:$0xff]  ;;  %v245_v26 = vld [vmem:[%s1810_s1 + $0xd0] sm:$0xff] }
  0x3b   : > { %242 = vst [vmem:[#allocation2 + $0xc0] sm:$0xff] %v241_v24  ;;  %244 = vst [vmem:[#allocation2 + $0xc8] sm:$0xff] %v243_v25  ;;  %v247_v27 = vld [vmem:[%s1810_s1 + $0xd8] sm:$0xff]  ;;  %v249_v28 = vld [vmem:[%s1810_s1 + $0xe0] sm:$0xff] }
  0x3c   : > { %246 = vst [vmem:[#allocation2 + $0xd0] sm:$0xff] %v245_v26  ;;  %v251_v29 = vld [vmem:[%s1810_s1 + $0xe8] sm:$0xff]  ;;  %248 = vst [vmem:[#allocation2 + $0xd8] sm:$0xff] %v247_v27  ;;  %v253_v30 = vld [vmem:[%s1810_s1 + $0xf0] sm:$0xff] }
  0x3d   : > { %250 = vst [vmem:[#allocation2 + $0xe0] sm:$0xff] %v249_v28  ;;  %252 = vst [vmem:[#allocation2 + $0xe8] sm:$0xff] %v251_v29  ;;  %v255_v31 = vld [vmem:[%s1810_s1 + $0xf8] sm:$0xff] }
  0x3e   : > { %254 = vst [vmem:[#allocation2 + $0xf0] sm:$0xff] %v253_v30  ;;  %256 = vst [vmem:[#allocation2 + $0xf8] sm:$0xff] %v255_v31 }
  0x3f   : > { %264 = vsyncadd [#allocation7], 4096 }
  0x40   : > { %1281 = dma.done.wait [#allocation7], 4096 }
  0x41   : > { %1282 = vsyncadd [#allocation7], 4294963200  ;;  %s1447_s15 = sld [smem:[#allocation9]]  ;;  %s1449_s16 = sld [smem:[#allocation9 + $0x1]]  ;;  %vm554_vm0 = vcmask 7168   ;;  %v1300_v32 = vmov -inf  }
  0x42   : > { %s1451_s22 = sld [smem:[#allocation9 + $0x2]]  ;;  %s1453_s23 = sld [smem:[#allocation9 + $0x3]]  ;;  %555 = vst.msk [vmem:[#allocation4] sm:$0xff] %vm554_vm0, %v1300_v32  ;;  %v1301_v33 = vmov 0.0   ;;  %vm537_vm1 = vcmask 1040384   ;;  %vm539_vm2 = vcmask 1041408  }
  0x43   : > { %s1455_s24 = sld [smem:[#allocation9 + $0x4]]  ;;  %s1457_s25 = sld [smem:[#allocation9 + $0x5]]  ;;  %556 = vst.msk [vmem:[#allocation5] sm:$0xff] %vm554_vm0, %v1301_v33  ;;  %vm541_vm3 = vcmask 1042432   ;;  %vm543_vm4 = vcmask 1043456   ;;  %vm545_vm5 = vcmask 1044480  }
  0x44   : > { %s1459_s26 = sld [smem:[#allocation9 + $0x6]]  ;;  %s1461_s27 = sld [smem:[#allocation9 + $0x7]]  ;;  %vm547_vm6 = vcmask 1045504   ;;  %vm549_vm7 = vcmask 1046528   ;;  %vm552_vm8 = vcmask 261120  }
  0x45   : > { %s999_s28 = sld [smem:[#allocation9 + $0x80]]  ;;  %s1000_s29 = sld [smem:[#allocation9 + $0x81]] }
  0x46   : > { %s1463_s30 = sld [smem:[#allocation9 + $0x82]]  ;;  %s1465_s4 = sld [smem:[#allocation9 + $0x83]] }
  0x47   : > { %s1467_s5 = sld [smem:[#allocation9 + $0x84]]  ;;  %s1469_s6 = sld [smem:[#allocation9 + $0x85]] }
  0x48   : > { %s1471_s7 = sld [smem:[#allocation9 + $0x86]]  ;;  %s1473_s8 = sld [smem:[#allocation9 + $0x87]] }
  0x49   : > { %s1007_s9 = sld [smem:[#allocation9 + $0x100]]  ;;  %s1008_s10 = sld [smem:[#allocation9 + $0x101]] }
  0x4a   : > { %1811 = sst [smem:[#allocation20_spill]] %s1461_s27  ;;  %s1475_s11 = sld [smem:[#allocation9 + $0x102]] }
  0x4b   : > { %s1477_s12 = sld [smem:[#allocation9 + $0x103]]  ;;  %s1479_s13 = sld [smem:[#allocation9 + $0x104]] }
  0x4c   : > { %s1481_s14 = sld [smem:[#allocation9 + $0x105]]  ;;  %s1483_s20 = sld [smem:[#allocation9 + $0x106]] }
  0x4d   : > { %s1485_s19 = sld [smem:[#allocation9 + $0x107]]  ;;  %s300_s1 = scalar_lea.vmem [#allocation2], %s999_s28 }
  0x4e   : > { %1812 = sst [smem:[#allocation21_spill]] %s1473_s8  ;;  %v301_v34 = vld [vmem:[%s300_s1] sm:$0x1]  ;;  %s1489_s18 = sld [smem:[#allocation9 + $0x181]] }
  0x4f   : > { %s1487_s21 = sld [smem:[#allocation9 + $0x180]]  ;;  %s303_s3 = scalar_lea.vmem [#allocation2], %s1000_s29 }
  0x50   : > { %v304_v35 = vld [vmem:[%s303_s3] sm:$0x1]  ;;  %s1491_s0 = sld [smem:[#allocation9 + $0x182]]  ;;  %s1493_s2 = sld [smem:[#allocation9 + $0x183]] }
  0x51   : > { %s331_s17 = scalar_lea.vmem [#allocation2], %s1007_s9  ;;  %s1495_s27 = sld [smem:[#allocation9 + $0x184]]  ;;  %v305_v39 = vadd.f32 %v304_v35, %v301_v34 }
  0x52   : > { %v332_v36 = vld [vmem:[%s331_s17] sm:$0x1]  ;;  %s334_s1 = scalar_lea.vmem [#allocation2], %s1008_s10  ;;  %s1499_s28 = sld [smem:[#allocation9 + $0x186]] }
  0x53   : > { %1813 = sst [smem:[#allocation22_spill]] %s1485_s19  ;;  %s1497_s19 = sld [smem:[#allocation9 + $0x185]]  ;;  %v335_v37 = vld [vmem:[%s334_s1] sm:$0x1] }
  0x54   : > { %s1501_s29 = sld [smem:[#allocation9 + $0x200]]  ;;  %s1503_s3 = sld [smem:[#allocation9 + $0x201]]  ;;  %v336_v42 = vadd.f32 %v335_v37, %v332_v36 }
  0x55   : > { %s269_s8 = scalar_lea.vmem [#allocation2], %s1447_s15  ;;  %s1506_s17 = sld [smem:[#allocation9 + $0x202]] }
  0x56   : > { %v270_v38 = vld [vmem:[%s269_s8] sm:$0x1]  ;;  %s1508_s9 = sld [smem:[#allocation9 + $0x203]]  ;;  %s307_s10 = scalar_lea.vmem [#allocation2], %s1463_s30 }
  0x57   : > { %v308_v41 = vld [vmem:[%s307_s10] sm:$0x1]  ;;  %s338_s1 = scalar_lea.vmem [#allocation2], %s1475_s11  ;;  %s362_s15 = scalar_lea.vmem [#allocation2], %s1487_s21 }
  0x58   : > { %1815 = sst [smem:[#allocation24_spill]] %s1499_s28  ;;  %v339_v43 = vld [vmem:[%s338_s1] sm:$0x1]  ;;  %s1513_s28 = sld [smem:[#allocation9 + $0x187]]  ;;  %v309_v48 = vadd.f32 %v308_v41, %v305_v39 }
  0x59   : > { %1814 = sst [smem:[#allocation23_spill]] %s1497_s19  ;;  %s272_s19 = scalar_lea.vmem [#allocation2], %s1449_s16  ;;  %v363_v44 = vld [vmem:[%s362_s15] sm:$0x1]  ;;  %v340_v50 = vadd.f32 %v339_v43, %v336_v42 }
  0x5a   : > { %v273_v40 = vld [vmem:[%s272_s19] sm:$0x1]  ;;  %s365_s8 = scalar_lea.vmem [#allocation2], %s1489_s18  ;;  %s276_s16 = scalar_lea.vmem [#allocation2], %s1451_s22 }
  0x5b   : > { %v366_v45 = vld [vmem:[%s365_s8] sm:$0x1]  ;;  %v274_v46 = vadd.f32 %v273_v40, %v270_v38  ;;  %s311_s19 = scalar_lea.vmem [#allocation2], %s1465_s4  ;;  %s342_s30 = scalar_lea.vmem [#allocation2], %s1477_s12 }
  0x5c   : > { %v277_v47 = vld [vmem:[%s276_s16] sm:$0x1]  ;;  %v367_v52 = vadd.f32 %v366_v45, %v363_v44  ;;  %s393_s11 = scalar_lea.vmem [#allocation2], %s1501_s29  ;;  %s396_s21 = scalar_lea.vmem [#allocation2], %s1503_s3 }
  0x5d   : > { %v312_v49 = vld [vmem:[%s311_s19] sm:$0x1]  ;;  %s280_s18 = scalar_lea.vmem [#allocation2], %s1453_s23  ;;  %s369_s10 = scalar_lea.vmem [#allocation2], %s1491_s0  ;;  %v278_v57 = vadd.f32 %v277_v47, %v274_v46 }
  0x5e   : > { %v343_v51 = vld [vmem:[%s342_s30] sm:$0x1]  ;;  %s1524_s22 = sld [smem:[#allocation9 + $0x204]]  ;;  %v313_v58 = vadd.f32 %v312_v49, %v309_v48  ;;  %s315_s4 = scalar_lea.vmem [#allocation2], %s1467_s5 }
  0x5f   : > { %v394_v53 = vld [vmem:[%s393_s11] sm:$0x1]  ;;  %s1527_s12 = sld [smem:[#allocation9 + $0x205]]  ;;  %s1529_s1 = sld [smem:[#allocation9 + $0x206]]  ;;  %v344_v60 = vadd.f32 %v343_v51, %v340_v50 }
  0x60   : > { %v397_v54 = vld [vmem:[%s396_s21] sm:$0x1]  ;;  %s346_s29 = scalar_lea.vmem [#allocation2], %s1479_s13  ;;  %s1532_s23 = sld [smem:[#allocation9 + $0x207]] }
  0x61   : > { %v281_v55 = vld [vmem:[%s280_s18] sm:$0x1]  ;;  %v398_v62 = vadd.f32 %v397_v54, %v394_v53  ;;  %s1534_s0 = sld [smem:[#allocation9 + $0x280]]  ;;  %s400_s3 = scalar_lea.vmem [#allocation2], %s1506_s17 }
  0x62   : > { %v370_v56 = vld [vmem:[%s369_s10] sm:$0x1]  ;;  %s1537_s15 = sld [smem:[#allocation9 + $0x281]]  ;;  %s1539_s5 = sld [smem:[#allocation9 + $0x282]]  ;;  %v282_v2 = vadd.f32 %v281_v55, %v278_v57 }
  0x63   : > { %v316_v59 = vld [vmem:[%s315_s4] sm:$0x1]  ;;  %v371_v63 = vadd.f32 %v370_v56, %v367_v52  ;;  %s373_s8 = scalar_lea.vmem [#allocation2], %s1493_s2  ;;  %s1542_s16 = sld [smem:[#allocation9 + $0x283]] }
  0x64   : > { %v347_v61 = vld [vmem:[%s346_s29] sm:$0x1]  ;;  %s1544_s13 = sld [smem:[#allocation9 + $0x284]]  ;;  %s284_s19 = scalar_lea.vmem [#allocation2], %s1455_s24  ;;  %v317_v4 = vadd.f32 %v316_v59, %v313_v58 }
  0x65   : > { %v401_v0 = vld [vmem:[%s400_s3] sm:$0x1]  ;;  %s1547_s17 = sld [smem:[#allocation9 + $0x285]]  ;;  %s1549_s30 = sld [smem:[#allocation9 + $0x286]]  ;;  %v348_v6 = vadd.f32 %v347_v61, %v344_v60 }
  0x66   : > { %v374_v1 = vld [vmem:[%s373_s8] sm:$0x1]  ;;  %s319_s11 = scalar_lea.vmem [#allocation2], %s1469_s6  ;;  %v402_v7 = vadd.f32 %v401_v0, %v398_v62  ;;  %s1552_s2 = sld [smem:[#allocation9 + $0x287]] }
  0x67   : > { %v285_v3 = vld [vmem:[%s284_s19] sm:$0x1]  ;;  %s350_s21 = scalar_lea.vmem [#allocation2], %s1481_s14  ;;  %v375_v9 = vadd.f32 %v374_v1, %v371_v63  ;;  %s404_s24 = scalar_lea.vmem [#allocation2], %s1508_s9 }
  0x68   : > { %v320_v5 = vld [vmem:[%s319_s11] sm:$0x1]  ;;  %s288_s18 = scalar_lea.vmem [#allocation2], %s1457_s25  ;;  %s377_s10 = scalar_lea.vmem [#allocation2], %s1495_s27  ;;  %v286_v13 = vadd.f32 %v285_v3, %v282_v2 }
  0x69   : > { %v351_v8 = vld [vmem:[%s350_s21] sm:$0x1]  ;;  %v321_v14 = vadd.f32 %v320_v5, %v317_v4  ;;  %s323_s6 = scalar_lea.vmem [#allocation2], %s1471_s7  ;;  %s424_s4 = scalar_lea.vmem [#allocation2], %s1534_s0 }
  0x6a   : > { %v405_v10 = vld [vmem:[%s404_s24] sm:$0x1]  ;;  %s1816_s29 = sld [smem:[#allocation21_spill]]  ;;  %v352_v17 = vadd.f32 %v351_v8, %v348_v6  ;;  %s1817_s14 = sld [smem:[#allocation23_spill]] }
  0x6b   : > { %v289_v11 = vld [vmem:[%s288_s18] sm:$0x1]  ;;  %v406_v18 = vadd.f32 %v405_v10, %v402_v7  ;;  %s427_s9 = scalar_lea.vmem [#allocation2], %s1537_s15  ;;  %s431_s25 = scalar_lea.vmem [#allocation2], %s1539_s5 }
  0x6c   : > { %v378_v12 = vld [vmem:[%s377_s10] sm:$0x1]  ;;  %s354_s3 = scalar_lea.vmem [#allocation2], %s1483_s20  ;;  %s1818_s27 = sld [smem:[#allocation22_spill]]  ;;  %v290_v29 = vadd.f32 %v289_v11, %v286_v13 }
  0x6d   : > { %v324_v15 = vld [vmem:[%s323_s6] sm:$0x1]  ;;  %v379_v22 = vadd.f32 %v378_v12, %v375_v9  ;;  %s408_s8 = scalar_lea.vmem [#allocation2], %s1524_s22  ;;  %s292_s7 = scalar_lea.vmem [#allocation2], %s1459_s26 }
  0x6e   : > { %v425_v16 = vld [vmem:[%s424_s4] sm:$0x1]  ;;  %s435_s11 = scalar_lea.vmem [#allocation2], %s1542_s16  ;;  %v325_v30 = vadd.f32 %v324_v15, %v321_v14  ;;  %s1819_s20 = sld [smem:[#allocation24_spill]] }
  0x6f   : > { %v428_v19 = vld [vmem:[%s427_s9] sm:$0x1]  ;;  %s1569_s5 = sld [smem:[#allocation9 + $0x300]]  ;;  %s1571_s22 = sld [smem:[#allocation9 + $0x301]] }
  0x70   : > { %v432_v20 = vld [vmem:[%s431_s25] sm:$0x1]  ;;  %v429_v24 = vadd.f32 %v428_v19, %v425_v16  ;;  %s327_s0 = scalar_lea.vmem [#allocation2], %s1816_s29  ;;  %s381_s19 = scalar_lea.vmem [#allocation2], %s1817_s14 }
  0x71   : > { %v355_v21 = vld [vmem:[%s354_s3] sm:$0x1]  ;;  %s439_s26 = scalar_lea.vmem [#allocation2], %s1544_s13  ;;  %s1820_s21 = sld [smem:[#allocation20_spill]] }
  0x72   : > { %v409_v23 = vld [vmem:[%s408_s8] sm:$0x1]  ;;  %s358_s15 = scalar_lea.vmem [#allocation2], %s1818_s27  ;;  %v433_v32 = vadd.f32 %v432_v20, %v429_v24  ;;  %v356_v33 = vadd.f32 %v355_v21, %v352_v17  ;;  %s1574_s24 = sld [smem:[#allocation9 + $0x302]] }
  0x73   : > { %v293_v25 = vld [vmem:[%s292_s7] sm:$0x1]  ;;  %v410_v34 = vadd.f32 %v409_v23, %v406_v18  ;;  %s1576_s16 = sld [smem:[#allocation9 + $0x303]]  ;;  %s412_s18 = scalar_lea.vmem [#allocation2], %s1527_s12 }
  0x74   : > { %v328_v26 = vld [vmem:[%s327_s0] sm:$0x1]  ;;  %s1579_s10 = sld [smem:[#allocation9 + $0x304]]  ;;  %s1581_s6 = sld [smem:[#allocation9 + $0x305]]  ;;  %v294_v40 = vadd.f32 %v293_v25, %v290_v29 }
  0x75   : > { %v382_v27 = vld [vmem:[%s381_s19] sm:$0x1]  ;;  %s385_s4 = scalar_lea.vmem [#allocation2], %s1819_s20  ;;  %s1584_s29 = sld [smem:[#allocation9 + $0x306]]  ;;  %v329_v42 = vadd.f32 %v328_v26, %v325_v30 }
  0x76   : > { %v436_v28 = vld [vmem:[%s435_s11] sm:$0x1]  ;;  %v383_v36 = vadd.f32 %v382_v27, %v379_v22  ;;  %s1586_s13 = sld [smem:[#allocation9 + $0x307]]  ;;  %s1589_s12 = sld [smem:[#allocation9 + $0x380]] }
  0x77   : > { %v359_v31 = vld [vmem:[%s358_s15] sm:$0x1]  ;;  %v437_v38 = vadd.f32 %v436_v28, %v433_v32  ;;  %s296_s14 = scalar_lea.vmem [#allocation2], %s1820_s21  ;;  %s1591_s9 = sld [smem:[#allocation9 + $0x381]]  ;;  %v517_v56 = vrot.slane %v329_v42, 7 }
  0x78   : > { %v440_v35 = vld [vmem:[%s439_s26] sm:$0x1]  ;;  %v360_v44 = vadd.f32 %v359_v31, %v356_v33  ;;  %s443_s25 = scalar_lea.vmem [#allocation2], %s1547_s17  ;;  %s1594_s3 = sld [smem:[#allocation9 + $0x382]] }
  0x79   : > { %v413_v37 = vld [vmem:[%s412_s18] sm:$0x1]  ;;  %v441_v43 = vadd.f32 %v440_v35, %v437_v38  ;;  %s1596_s27 = sld [smem:[#allocation9 + $0x383]]  ;;  %s389_s8 = scalar_lea.vmem [#allocation2], %s1513_s28 }
  0x7a   : > { %v386_v39 = vld [vmem:[%s385_s4] sm:$0x1]  ;;  %v414_v45 = vadd.f32 %v413_v37, %v410_v34  ;;  %s416_s7 = scalar_lea.vmem [#allocation2], %s1529_s1  ;;  %s455_s0 = scalar_lea.vmem [#allocation2], %s1569_s5  ;;  %v520_v60 = vrot.slane %v360_v44, 6 }
  0x7b   : > { %v297_v41 = vld [vmem:[%s296_s14] sm:$0x1]  ;;  %v387_v47 = vadd.f32 %v386_v39, %v383_v36  ;;  %s458_s19 = scalar_lea.vmem [#allocation2], %s1571_s22  ;;  %s462_s17 = scalar_lea.vmem [#allocation2], %s1574_s24 }
  0x7c   : > { %v444_v46 = vld [vmem:[%s443_s25] sm:$0x1]  ;;  %v298_v52 = vadd.f32 %v297_v41, %v294_v40  ;;  %s447_s28 = scalar_lea.vmem [#allocation2], %s1549_s30  ;;  %s466_s1 = scalar_lea.vmem [#allocation2], %s1576_s16 }
  0x7d   : > { %v390_v48 = vld [vmem:[%s389_s8] sm:$0x1]  ;;  %v445_v53 = vadd.f32 %v444_v46, %v441_v43  ;;  %s420_s11 = scalar_lea.vmem [#allocation2], %s1532_s23  ;;  %s470_s15 = scalar_lea.vmem [#allocation2], %s1579_s10 }
  0x7e   : > { %v417_v49 = vld [vmem:[%s416_s7] sm:$0x1]  ;;  %v391_v61 = vadd.f32 %v390_v48, %v387_v47  ;;  %s451_s20 = scalar_lea.vmem [#allocation2], %s1552_s2  ;;  %s474_s5 = scalar_lea.vmem [#allocation2], %s1581_s6  ;;  %v538_v9 = vsel %vm537_vm1, %v298_v52, %v517_v56 }
  0x7f   : > { %v456_v50 = vld [vmem:[%s455_s0] sm:$0x1]  ;;  %v418_v57 = vadd.f32 %v417_v49, %v414_v45  ;;  %s486_s30 = scalar_lea.vmem [#allocation2], %s1589_s12  ;;  %s489_s22 = scalar_lea.vmem [#allocation2], %s1591_s9  ;;  %v540_v16 = vsel %vm539_vm2, %v538_v9, %v520_v60 }
  0x80   : > { %v459_v51 = vld [vmem:[%s458_s19] sm:$0x1]  ;;  %s493_s26 = scalar_lea.vmem [#allocation2], %s1594_s3  ;;  %s1051_s23 = sld [smem:[#allocation9 + $0x384]]  ;;  %v523_v14 = vrot.slane %v391_v61, 5 }
  0x81   : > { %v460_v54 = vadd.f32 %v459_v51, %v456_v50  ;;  %v463_v55 = vld [vmem:[%s462_s17] sm:$0x1]  ;;  %s497_s2 = scalar_lea.vmem [#allocation2], %s1596_s27  ;;  %s1052_s21 = sld [smem:[#allocation9 + $0x385]] }
  0x82   : > { %v448_v58 = vld [vmem:[%s447_s28] sm:$0x1]  ;;  %s1053_s24 = sld [smem:[#allocation9 + $0x386]]  ;;  %s1054_s16 = sld [smem:[#allocation9 + $0x387]]  ;;  %v542_v23 = vsel %vm541_vm3, %v540_v16, %v523_v14 }
  0x83   : > { %v467_v59 = vld [vmem:[%s466_s1] sm:$0x1]  ;;  %v464_v63 = vadd.f32 %v463_v55, %v460_v54  ;;  %v449_v5 = vadd.f32 %v448_v58, %v445_v53  ;;  %s478_s18 = scalar_lea.vmem [#allocation2], %s1584_s29  ;;  %s482_s10 = scalar_lea.vmem [#allocation2], %s1586_s13 }
  0x84   : > { %v421_v62 = vld [vmem:[%s420_s11] sm:$0x1] }
  0x85   : > { %v471_v0 = vld [vmem:[%s470_s15] sm:$0x1]  ;;  %v468_v6 = vadd.f32 %v467_v59, %v464_v63  ;;  %v422_v10 = vadd.f32 %v421_v62, %v418_v57 }
  0x86   : > { %v452_v1 = vld [vmem:[%s451_s20] sm:$0x1]  ;;  %s501_s6 = scalar_lea.vmem [#allocation2], %s1051_s23 }
  0x87   : > { %v475_v2 = vld [vmem:[%s474_s5] sm:$0x1]  ;;  %v472_v12 = vadd.f32 %v471_v0, %v468_v6  ;;  %v453_v17 = vadd.f32 %v452_v1, %v449_v5  ;;  %v526_v21 = vrot.slane %v422_v10, 4  ;;  %s505_s4 = scalar_lea.vmem [#allocation2], %s1052_s21 }
  0x88   : > { %v487_v3 = vld [vmem:[%s486_s30] sm:$0x1]  ;;  %s509_s29 = scalar_lea.vmem [#allocation2], %s1053_s24  ;;  %s513_s14 = scalar_lea.vmem [#allocation2], %s1054_s16 }
  0x89   : > { %v490_v4 = vld [vmem:[%s489_s22] sm:$0x1]  ;;  %v476_v18 = vadd.f32 %v475_v2, %v472_v12  ;;  %v529_v28 = vrot.slane %v453_v17, 3  ;;  %v544_v30 = vsel %vm543_vm4, %v542_v23, %v526_v21 }
  0x8a   : > { %v491_v7 = vadd.f32 %v490_v4, %v487_v3  ;;  %v494_v8 = vld [vmem:[%s493_s26] sm:$0x1] }
  0x8b   : > { %v498_v11 = vld [vmem:[%s497_s2] sm:$0x1]  ;;  %v546_v35 = vsel %vm545_vm5, %v544_v30, %v529_v28 }
  0x8c   : > { %v495_v13 = vadd.f32 %v494_v8, %v491_v7  ;;  %v479_v15 = vld [vmem:[%s478_s18] sm:$0x1] }
  0x8d   : > { %v483_v20 = vld [vmem:[%s482_s10] sm:$0x1]  ;;  %v480_v22 = vadd.f32 %v479_v15, %v476_v18 }
  0x8e   : > { %v499_v19 = vadd.f32 %v498_v11, %v495_v13  ;;  %v502_v24 = vld [vmem:[%s501_s6] sm:$0x1] }
  0x8f   : > { %v484_v25 = vadd.f32 %v483_v20, %v480_v22  ;;  %v506_v27 = vld [vmem:[%s505_s4] sm:$0x1] }
  0x90   : > { %v503_v26 = vadd.f32 %v502_v24, %v499_v19  ;;  %v510_v29 = vld [vmem:[%s509_s29] sm:$0x1] }
  0x91   : > { %v514_v32 = vld [vmem:[%s513_s14] sm:$0x1]  ;;  %v532_v33 = vrot.slane %v484_v25, 2 }
  0x92   : > { %v507_v31 = vadd.f32 %v506_v27, %v503_v26 }
  0x93   : > { %v548_v37 = vsel %vm547_vm6, %v546_v35, %v532_v33 }
  0x94   : > { %v511_v34 = vadd.f32 %v510_v29, %v507_v31 }
  0x96   : > { %v515_v36 = vadd.f32 %v514_v32, %v511_v34 }
  0x98   : > { %v535_v38 = vrot.slane %v515_v36, 1 }
  0x9a   : > { %v550_v39 = vsel %vm549_vm7, %v548_v37, %v535_v38 }
  0x9b   : > { %v551_v40 = vmul.f32 0.125, %v550_v39 }
  0x9d   : > { %553 = vst.msk [vmem:[#allocation3] sm:$0xff] %vm552_vm8, %v551_v40 }
  0x9e PF: > { %s1821_s13 = sld [smem:[#allocation16_spill]] }
  0xa4   : > { %p1055_p10 = scmp.ne.s32.totalorder %s1821_s13, 0 }
  0xa5   : > { %s1822_s25 = sld [smem:[#allocation26_spill]] (!%p1055_p10)  ;;  %vm593_vm9 = vcmask (!%p1055_p10), 261120   ;;  %v560_v57 = vld [vmem:[#allocation3] sm:$0xff] (!%p1055_p10)  ;;  %v1302_v30 = vmov (!%p1055_p10), 0   ;;  %v769_v31 = vld [vmem:[#allocation4] sm:$0xff] (!%p1055_p10)  ;;  %vm794_vm11 = vcmask (!%p1055_p10), 7168  }
  0xa6   : > { %559 = sbr.rel (%p1055_p10) target bundleno = 888 (0x378), region = 66  ;;  %vm1629_vm10 = vmpackc.low (!%p1055_p10), %vm593_vm9, %vm593_vm9  ;;  %1128 = vmatprep.mubr.msk.f32.mxu0 (!%p1055_p10), %vm593_vm9, %v560_v57  ;;  %1219 = vset.pattern.permute.xlu0 (!%p1055_p10), %v1302_v30  ;;  %v774_v45 = vld [vmem:[#allocation5] sm:$0xff] (!%p1055_p10) }
  0xab   : > { %v577_v41 = vld [vmem:[%s1822_s25 + $0x80] sm:$0xff] (!%p1055_p10)  ;;  %v578_v42 = vld [vmem:[%s1822_s25 + $0x88] sm:$0xff] (!%p1055_p10)  ;;  %v579_v47 = vld [vmem:[%s1822_s25 + $0x90] sm:$0xff] (!%p1055_p10) }
  0xac   : > { %v561_v43 = vld [vmem:[%s1822_s25] sm:$0xff] (!%p1055_p10)  ;;  %v1130_v44 = vpack.c.bf16 (!%p1055_p10), %v578_v42, %v577_v41  ;;  %v562_v46 = vld [vmem:[%s1822_s25 + $0x8] sm:$0xff] (!%p1055_p10)  ;;  %v580_v49 = vld [vmem:[%s1822_s25 + $0x98] sm:$0xff] (!%p1055_p10) }
  0xad   : > { %v1133_v48 = vpack.c.bf16 %v562_v46, %v561_v43  ;;  %v1136_v50 = vpack.c.bf16 %v580_v49, %v579_v47  ;;  %v563_v51 = vld [vmem:[%s1822_s25 + $0x10] sm:$0xff]  ;;  %v564_v52 = vld [vmem:[%s1822_s25 + $0x18] sm:$0xff]  ;;  %v581_v53 = vld [vmem:[%s1822_s25 + $0xa0] sm:$0xff] }
  0xae   : > { %1132 = vmatprep.subr.msk.bf16.mxu0 %vm1629_vm10, %v1130_v44  ;;  %v582_v54 = vld [vmem:[%s1822_s25 + $0xa8] sm:$0xff]  ;;  %v1139_v55 = vpack.c.bf16 %v564_v52, %v563_v51  ;;  %v565_v58 = vld [vmem:[%s1822_s25 + $0x20] sm:$0xff]  ;;  %v583_v60 = vld [vmem:[%s1822_s25 + $0xb0] sm:$0xff] }
  0xaf   : > { %1135 = vmatpush3.bf16.xpose.msk.msra.mxu0 %vm1629_vm10, %v1133_v48  ;;  %v1142_v56 = vpack.c.bf16 %v582_v54, %v581_v53  ;;  %v566_v59 = vld [vmem:[%s1822_s25 + $0x28] sm:$0xff]  ;;  %v584_v61 = vld [vmem:[%s1822_s25 + $0xb8] sm:$0xff]  ;;  %v567_v0 = vld [vmem:[%s1822_s25 + $0x30] sm:$0xff] }
  0xb0   : > { %1138 = vmatprep.subr.msk.bf16.mxu0 %vm1629_vm10, %v1136_v50  ;;  %v1145_v62 = vpack.c.bf16 %v566_v59, %v565_v58  ;;  %v1148_v63 = vpack.c.bf16 %v584_v61, %v583_v60  ;;  %v568_v1 = vld [vmem:[%s1822_s25 + $0x38] sm:$0xff]  ;;  %v585_v2 = vld [vmem:[%s1822_s25 + $0xc0] sm:$0xff]  ;;  %v586_v3 = vld [vmem:[%s1822_s25 + $0xc8] sm:$0xff] }
  0xb1   : > { %v1151_v4 = vpack.c.bf16 %v568_v1, %v567_v0  ;;  %v1154_v5 = vpack.c.bf16 %v586_v3, %v585_v2  ;;  %v569_v6 = vld [vmem:[%s1822_s25 + $0x40] sm:$0xff]  ;;  %v570_v7 = vld [vmem:[%s1822_s25 + $0x48] sm:$0xff]  ;;  %v587_v8 = vld [vmem:[%s1822_s25 + $0xd0] sm:$0xff] }
  0xb2   : > { %v588_v9 = vld [vmem:[%s1822_s25 + $0xd8] sm:$0xff]  ;;  %v1157_v10 = vpack.c.bf16 %v570_v7, %v569_v6  ;;  %v571_v12 = vld [vmem:[%s1822_s25 + $0x50] sm:$0xff]  ;;  %v589_v14 = vld [vmem:[%s1822_s25 + $0xe0] sm:$0xff] }
  0xb3   : > { %v1160_v11 = vpack.c.bf16 %v588_v9, %v587_v8  ;;  %v572_v13 = vld [vmem:[%s1822_s25 + $0x58] sm:$0xff]  ;;  %v590_v15 = vld [vmem:[%s1822_s25 + $0xe8] sm:$0xff]  ;;  %v573_v18 = vld [vmem:[%s1822_s25 + $0x60] sm:$0xff] }
  0xb4   : > { %v1163_v16 = vpack.c.bf16 %v572_v13, %v571_v12  ;;  %v1166_v17 = vpack.c.bf16 %v590_v15, %v589_v14  ;;  %v574_v19 = vld [vmem:[%s1822_s25 + $0x68] sm:$0xff]  ;;  %v591_v20 = vld [vmem:[%s1822_s25 + $0xf0] sm:$0xff]  ;;  %v592_v21 = vld [vmem:[%s1822_s25 + $0xf8] sm:$0xff] }
  0xb5   : > { %v1169_v22 = vpack.c.bf16 %v574_v19, %v573_v18  ;;  %v1172_v23 = vpack.c.bf16 %v592_v21, %v591_v20  ;;  %v575_v24 = vld [vmem:[%s1822_s25 + $0x70] sm:$0xff]  ;;  %v576_v25 = vld [vmem:[%s1822_s25 + $0x78] sm:$0xff] }
  0xb6   : > { %v1175_v26 = vpack.c.bf16 %v576_v25, %v575_v24 }
  0xb7   : > { %1141 = vmatpush3.bf16.xpose.msk.msra.mxu0 %vm1629_vm10, %v1139_v55 }
  0xb8   : > { %1144 = vmatprep.subr.msk.bf16.mxu0 %vm1629_vm10, %v1142_v56 }
  0xbf   : > { %1147 = vmatpush3.bf16.xpose.msk.msra.mxu0 %vm1629_vm10, %v1145_v62 }
  0xc0   : > { %1150 = vmatprep.subr.msk.bf16.mxu0 %vm1629_vm10, %v1148_v63 }
  0xc7   : > { %1153 = vmatpush3.bf16.xpose.msk.msra.mxu0 %vm1629_vm10, %v1151_v4 }
  0xc8   : > { %1156 = vmatprep.subr.msk.bf16.mxu0 %vm1629_vm10, %v1154_v5 }
  0xcf   : > { %1159 = vmatpush3.bf16.xpose.msk.msra.mxu0 %vm1629_vm10, %v1157_v10 }
  0xd0   : > { %1162 = vmatprep.subr.msk.bf16.mxu0 %vm1629_vm10, %v1160_v11 }
  0xd7   : > { %1165 = vmatpush3.bf16.xpose.msk.msra.mxu0 %vm1629_vm10, %v1163_v16 }
  0xd8   : > { %1168 = vmatprep.subr.msk.bf16.mxu0 %vm1629_vm10, %v1166_v17 }
  0xdf   : > { %1171 = vmatpush3.bf16.xpose.msk.msra.mxu0 %vm1629_vm10, %v1169_v22 }
  0xe0   : > { %1174 = vmatprep.subr.msk.bf16.mxu0 %vm1629_vm10, %v1172_v23 }
  0xe7   : > { %1177 = vmatpush3.bf16.xpose.msk.msra.mxu0 %vm1629_vm10, %v1175_v26 }
  0xee   : > { %1129 = vmatmul.mubr.msk.f32.vlgmr.msra.gmra.mrb[0].mxu0 %vm593_vm9, %v560_v57 }
 0x1c1   : > { %v759_v27 = vpop.f32.mrb[0].mxu0 }
 0x1c2   : > { %767 = vst [vmem:[#allocation6] sm:$0xff] %v759_v27  ;;  %v761_v28 = vpop.f32.mrb[1].mxu0 }
 0x1c3   : > { %768 = vst [vmem:[#allocation6 + $0x8] sm:$0xff] %v761_v28  ;;  %v770_v29 = vmax.f32 %v759_v27, %v761_v28 }
 0x1c5   : > { %771 = vmax.xlane.f32.xlu0 %v770_v29 }
 0x252   : > { %v772_v32 = vpop.xlane.xlu0 %771 }
 0x253   : > { %v773_v33 = vmax.f32 %v769_v31, %v772_v32 }
 0x255   : > { %v775_v34 = vsub.f32 %v769_v31, %v773_v33  ;;  %796 = vst.msk [vmem:[#allocation4] sm:$0xff] %vm794_vm11, %v773_v33  ;;  %781 = vperm.xlu0 %1219, %v773_v33  }
 0x257   : > { %v776_v43 = vmul.f32 1.442695, %v775_v34 }
 0x2d4   : > { %v782_v35 = vpop.permute.xlu0 %781 }
 0x2d5   : > { %v784_v36 = vsub.f32 %v759_v27, %v782_v35  ;;  %v785_v37 = vsub.f32 %v761_v28, %v782_v35 }
 0x2d7   : > { %v786_v38 = vmul.f32 1.442695, %v784_v36  ;;  %v788_v39 = vmul.f32 1.442695, %v785_v37 }
 0x2d9   : > { %1220 = vpow2.f32 %v786_v38 }
 0x2da   : > { %1222 = vpow2.f32 %v788_v39 }
 0x2db   : > { %1224 = vpow2.f32 %v776_v43 }
 0x2e3   : > { %v1221_v40 = vpop.eup %1220 }
 0x2e4   : > { %v1223_v41 = vpop.eup %1222 }
 0x2e5   : > { %v790_v42 = vadd.f32 %v1223_v41, %v1221_v40  ;;  %v1225_v44 = vpop.eup %1224 }
 0x2e6   : > { %v778_v46 = vmul.f32 %v1225_v44, %v774_v45 }
 0x2e7   : > { %791 = vadd.xlane.f32.xlu1 %v790_v42 }
 0x374   : > { %v792_v47 = vpop.xlane.xlu1 %791 }
 0x375   : > { %v793_v48 = vadd.f32 %v792_v47, %v778_v46 }
 0x377   : > { %795 = vst.msk [vmem:[#allocation5] sm:$0xff] %vm794_vm11, %v793_v48 }
 0x378 PF: > { %s1825_s8 = sld [smem:[#allocation16_spill]] }
 0x37e   : > { %p1089_p11 = scmp.ne.s32.totalorder %s1825_s8, 1 }
 0x37f   : > { %v802_v49 = vld [vmem:[#allocation5] sm:$0xff] (!%p1089_p11)  ;;  %v1303_v50 = vmov (!%p1089_p11), 0   ;;  %v801_v52 = vld [vmem:[#allocation4] sm:$0xff] (!%p1089_p11)  ;;  %v809_v55 = vld [vmem:[#allocation6] sm:$0xff] (!%p1089_p11) }
 0x380   : > { %800 = sbr.rel (%p1089_p11) target bundleno = 1042 (0x412), region = 70  ;;  %1226 = vset.pattern.permute.xlu0 (!%p1089_p11), %v1303_v50  ;;  %1227 = vlog2.f32 (!%p1089_p11), %v802_v49  ;;  %v810_v56 = vld [vmem:[#allocation6 + $0x8] sm:$0xff] (!%p1089_p11) }
 0x38a   : > { %v1228_v51 = vpop.eup %1227 }
 0x38b   : > { %v804_v53 = vmul.f32 0.6931472, %v1228_v51 }
 0x38d   : > { %v805_v54 = vadd.f32 %v804_v53, %v801_v52 }
 0x38f   : > { %813 = vperm.xlu0 %1226, %v805_v54  }
 0x40e   : > { %v814_v57 = vpop.permute.xlu0 %813 }
 0x40f   : > { %v816_v58 = vsub.f32 %v809_v55, %v814_v57  ;;  %v817_v59 = vsub.f32 %v810_v56, %v814_v57 }
 0x411   : > { %818 = vst [vmem:[#allocation10] sm:$0xff] %v816_v58  ;;  %819 = vst [vmem:[#allocation10 + $0x8] sm:$0xff] %v817_v59 }
 0x412 PF: > { %s1826_s7 = sld [smem:[#allocation18_spill]]  ;;  %s1304_s17 = smov [#allocation10]  }
 0x413   : > { %s836_s28 = sshll.u32 %s1304_s17, 4  ;;  %s837_s28 = int_to_ptr.vmem [resolvable:$true] %s836_s28 }
 0x414   : > { %s1241_s1 = scalar_lea.vmem %s837_s28, 256  ;;  %s1247_s11 = scalar_lea.vmem %s837_s28, 512 }
 0x415   : > { %p1242_p13 = scmp.ne.s32.totalorder %s837_s28, %s1241_s1  ;;  %p1248_p2 = scmp.lt.s32.totalorder %s837_s28, %s837_s28 }
 0x416   : > { %p1249_p3 = scmp.lt.s32.totalorder %s1247_s11, %s1241_s1 }
 0x418   : > { %s1827_s0 = sadd.s32 4294967295, %s1826_s7   ;;  %p1250_p4 = por %p1249_p3, %p1248_p2 }
 0x419   : > { %p1759_p12 = scmp.eq.s32.totalorder %s1827_s0, 1 }
 0x41b   : > { %p1243_p0 = pnand %p1242_p13, %p1759_p12 }
 0x41d   : > { %p1244_p1 = pneg %p1243_p0 }
 0x41f   : > { %p1251_p5 = pnand %p1250_p4, %p1244_p1 }
 0x421   : > { %1254 = shalt.err (!%p1251_p5)
}
 0x422   : > { %s1829_s5 = sld [smem:[#allocation27_spill]] }
 0x428   : > { %s1255_s30 = scalar_lea.hbm %s1829_s5, 256 }
 0x429   : > { %p1256_p6 = scmp.ne.s32.totalorder %s1829_s5, %s1255_s30  ;;  %p1261_p9 = scmp.lt.u32.totalorder %s1255_s30, %s1829_s5 }
 0x42b   : > { %p1257_p7 = pnand %p1256_p6, %p1759_p12 }
 0x42d   : > { %p1258_p8 = pneg %p1257_p7 }
 0x42f   : > { %p1263_p10 = pnand %p1261_p9, %p1258_p8 }
 0x431   : > { %1266 = shalt.err (!%p1263_p10)
}
 0x432   : > { %1179 = dma.vmem_to_hbm [thread:$0]  (%p1759_p12), %s837_s28, 256, %s1829_s5, [#allocation11]  }
 0x433 PF: > { %s1830_s16 = sld [smem:[#allocation18_spill]] }
 0x439   : > { %p1187_p11 = scmp.ge.s32.totalorder %s1830_s16, 2  ;;  %s1831_s18 = sadd.s32 4294967294, %s1830_s16  }
 0x43a   : > { %p1188_p13 = scmp.eq.s32.totalorder %s1831_s18, 1 }
 0x43c   : > { %p1183_p0 = pnand %p1188_p13, %p1187_p11 }
 0x43e   : > { %1284 = dma.done.wait (!%p1183_p0), [#allocation11], 256  }
 0x43f   : > { %1286 = vsyncadd (!%p1183_p0), [#allocation11], 4294967040  ;;  %s22_s0 = sadd.s32 1, %s1830_s16   ;;  %s1832_s17 = sld [smem:[#allocation17_spill]] }
 0x440   : > { %p19_p1 = scmp.ge.s32.totalorder %s22_s0, 4   ;;  %s1833_s18 = sld [smem:[#allocation19_spill]] }
 0x442   :  { %21 = sbr.rel (!%p19_p1) target bundleno = 19 (0x13), region = 179 }
 0x449   :  { %854 = vsyncpa [#allocation11], 1 }
 0x44a   :  { %856 = vsyncpa [#allocation11 + $0x1], 1 }
 0x44b   :  { %857 = vsyncmov [#allocation7] }
 0x44e   :  { %s858_s10 = vpop.sfrf %857 }
 0x44f   :  { %p1094_p12 = scmp.ne.s32.totalorder %s858_s10, 0 }
 0x451   :  { %862 = shalt.err (%p1094_p12)  }

</bundles_post_ra>
